<compile_context>
chip_gen: v7x
topology: tpu7x:2x2x1
jax: 0.10.0
libtpu: 0.0.40
codegen_flags: <defaults>
</compile_context>

<pallas_src>
import functools

import jax
import jax.numpy as jnp
from jax.experimental import pallas as pl
from jax.experimental.pallas import tpu as pltpu


_RECURRENCE_UNROLL = 4
_VMEM_LIMIT_BYTES = 48 * 1024 * 1024   # fits v7x's 64 MiB VMEM with headroom


# ----------------------------------------------------------------------------
# Kernel 1: single LSTM layer, gridded (batch block, time chunk).
#   Input projection hoisted to one big MXU matmul per chunk; serial path keeps
#   only h @ W_hh + gate activations.  h/c carried in persistent VMEM scratch.
# ----------------------------------------------------------------------------
def lstm_layer_kernel(ilens_ref, x_ref, w_ih_ref, w_hh_ref, b_ref, o_ref,
                      xg_ref, h_ref, c_ref):
    # layout: x_ref (Tc, Nb, Dp) time-major chunk; w_ih_ref (Dp, 4Hp); w_hh_ref (Hp, 4Hp);
    #         b_ref (1, 4Hp) = b_ih + b_hh (gate blocks lane-aligned); ilens_ref (Nb, 1) int32;
    #         o_ref (Tc, Nb, Hp); xg_ref/h_ref/c_ref VMEM scratch.
    tc_idx = pl.program_id(1)

    @pl.when(tc_idx == 0)
    def _():                                   # new batch block -> reset carries
        h_ref[...] = jnp.zeros_like(h_ref)
        c_ref[...] = jnp.zeros_like(c_ref)

    Tc, Nb, Dp = x_ref.shape
    Hp = w_hh_ref.shape[0]

    # Hoisted input projection: one (Tc*Nb, Dp) x (Dp, 4Hp) MXU matmul, staged in VMEM.
    xg = jnp.dot(x_ref[...].reshape(Tc * Nb, Dp), w_ih_ref[...],
                 preferred_element_type=jnp.float32) + b_ref[...]
    xg_ref[...] = xg.reshape(Tc, Nb, 4 * Hp)

    w_hh = w_hh_ref[...]
    ilens = ilens_ref[...]                     # (Nb, 1) int32
    t0 = tc_idx * Tc                           # global time offset of this chunk

    def step(t, carry):
        h, c = carry
        gates = xg_ref[t] + jnp.dot(h, w_hh, preferred_element_type=jnp.float32)
        # PyTorch gate order i, f, g, o; each slice is 128-lane aligned (Hp % 128 == 0).
        i_g = jax.nn.sigmoid(gates[:, 0 * Hp:1 * Hp])
        f_g = jax.nn.sigmoid(gates[:, 1 * Hp:2 * Hp])
        g_g = jnp.tanh(gates[:, 2 * Hp:3 * Hp])
        o_g = jax.nn.sigmoid(gates[:, 3 * Hp:4 * Hp])
        c_new = f_g * c + i_g * g_g
        h_new = o_g * jnp.tanh(c_new)
        valid = ilens > (t0 + t)               # pad_packed_sequence: zero for t >= ilens[b]
        o_ref[t] = jnp.where(valid, h_new, 0.0)
        return (h_new, c_new)

    h, c = jax.lax.fori_loop(0, Tc, step, (h_ref[...], c_ref[...]),
                             unroll=_RECURRENCE_UNROLL)
    h_ref[...] = h
    c_ref[...] = c


# ----------------------------------------------------------------------------
# Kernel 2: Lookahead (depthwise conv over time, future context) + Linear, fused.
# Gridded over (batch block, time chunk); operates time-major like kernel 1.
# The cross-chunk halo comes from a second input block (next time chunk) and the
# right-zero-pad past the sequence end is a last-chunk mask.
# ----------------------------------------------------------------------------
def lookahead_linear_kernel(y_ref, y_nxt_ref, w_la_ref, w_lin_ref, b_ref, o_ref):
    # layout: y_ref / y_nxt_ref (Tc, Nb, Hp); w_la_ref (context, 1, Hp);
    #         w_lin_ref (Hp, Cp); b_ref (1, Cp); o_ref (Tc, Nb, Cp) lane-dense (Cp % 128 == 0).
    context = w_la_ref.shape[0]
    Tc, Nb, Hp = y_ref.shape
    Cp = o_ref.shape[2]
    last_chunk = pl.program_id(1) == pl.num_programs(1) - 1

    y0 = y_ref[...]                                   # (Tc, Nb, Hp)
    halo = y_nxt_ref[0:context - 1]                   # first taps of the next chunk
    halo = jnp.where(last_chunk, jnp.zeros_like(halo), halo)   # F.pad(..., (0, context-1))
    ywin = jnp.concatenate([y0, halo], axis=0)        # (Tc + context - 1, Nb, Hp)

    ahead = ywin[0:Tc] * w_la_ref[0]                  # out[t] = sum_k w[:, k] * y[t + k]
    for k in range(1, context):
        ahead = ahead + ywin[k:k + Tc] * w_la_ref[k]

    logits = jnp.dot(ahead.reshape(Tc * Nb, Hp), w_lin_ref[...],
                     preferred_element_type=jnp.float32) + b_ref[...]
    o_ref[...] = logits.reshape(Tc, Nb, Cp)


# ----------------------------------------------------------------------------
# Padding helpers (zero-fill so padded lanes stay exactly zero through the LSTM).
# ----------------------------------------------------------------------------
def _round_up(v, m):
    return ((v + m - 1) // m) * m


def _pad_gate_matrix(w, din_p, hdim, hdim_p):
    # w: (4*hdim, din) PyTorch layout -> (din_p, 4*hdim_p) with lane-aligned gate blocks.
    _, din = w.shape
    w4 = w.reshape(4, hdim, din)
    w4p = jnp.zeros((4, hdim_p, din_p), jnp.float32).at[:, :hdim, :din].set(w4)
    return jnp.transpose(w4p.reshape(4 * hdim_p, din_p), (1, 0))


def _pad_gate_bias(b, hdim, hdim_p):
    b4 = b.reshape(4, hdim)
    b4p = jnp.zeros((4, hdim_p), jnp.float32).at[:, :hdim].set(b4)
    return b4p.reshape(1, 4 * hdim_p)


# ----------------------------------------------------------------------------
# Wrapper (glue: one entry transpose, zero-pad to aligned shapes, param reshaping).
# ----------------------------------------------------------------------------
def lstm_row_conv_forward(params, x, ilens, *, time_chunk=128, batch_block=128):
    # layout: x (N, T, idim) batch-first; returns (logits (N, T, num_classes), olens).
    N, T, idim = x.shape
    hdim = params["lstm"][0][1].shape[1]
    context = params["w_conv"].shape[2]
    C = params["w_lin"].shape[0]

    Hp = _round_up(hdim, 128)          # lane-aligned hidden dim
    Dp0 = _round_up(idim, 128)         # lane-aligned input dim
    Cp = _round_up(C, 128)             # lane-dense output store

    Nb = min(_round_up(N, 8), batch_block)     # batch block (>= 8 sublanes)
    Np = _round_up(N, Nb)
    nb = Np // Nb

    Tc = min(time_chunk, T)                    # time chunk (leading dim: no tile constraint)
    T_pad = _round_up(T, Tc)
    nt = T_pad // Tc

    lstm_cp = pltpu.CompilerParams(
        dimension_semantics=("parallel", "arbitrary"),
        vmem_limit_bytes=_VMEM_LIMIT_BYTES)
    la_cp = pltpu.CompilerParams(
        dimension_semantics=("parallel", "parallel"),
        vmem_limit_bytes=_VMEM_LIMIT_BYTES)

    # Single entry transpose to time-major + alignment padding (zeros).
    x_tm = jnp.transpose(x, (1, 0, 2)).astype(jnp.float32)          # (T, N, idim)
    x_tm = jnp.pad(x_tm, ((0, T_pad - T), (0, Np - N), (0, Dp0 - idim)))
    ilens_p = jnp.pad(ilens.astype(jnp.int32), (0, Np - N))[:, None]  # (Np, 1); pad rows -> len 0

    out = x_tm
    for (w_ih, w_hh, b_ih, b_hh) in params["lstm"]:
        Dp = out.shape[2]
        w_ih_p = _pad_gate_matrix(w_ih, Dp, hdim, Hp)     # (Dp, 4Hp)
        w_hh_p = _pad_gate_matrix(w_hh, Hp, hdim, Hp)     # (Hp, 4Hp)
        b_p = _pad_gate_bias(b_ih + b_hh, hdim, Hp)       # (1, 4Hp)

        out = pl.pallas_call(
            lstm_layer_kernel,
            out_shape=jax.ShapeDtypeStruct((T_pad, Np, Hp), jnp.float32),
            grid=(nb, nt),
            in_specs=[
                pl.BlockSpec((Nb, 1), lambda b, t: (b, 0)),
                pl.BlockSpec((Tc, Nb, Dp), lambda b, t: (t, b, 0)),
                pl.BlockSpec((Dp, 4 * Hp), lambda b, t: (0, 0)),
                pl.BlockSpec((Hp, 4 * Hp), lambda b, t: (0, 0)),
                pl.BlockSpec((1, 4 * Hp), lambda b, t: (0, 0)),
            ],
            out_specs=pl.BlockSpec((Tc, Nb, Hp), lambda b, t: (t, b, 0)),
            scratch_shapes=[
                pltpu.VMEM((Tc, Nb, 4 * Hp), jnp.float32),   # staged input projection
                pltpu.VMEM((Nb, Hp), jnp.float32),           # h carry (persists over t-chunks)
                pltpu.VMEM((Nb, Hp), jnp.float32),           # c carry
            ],
            compiler_params=lstm_cp,
        )(ilens_p, out, w_ih_p, w_hh_p, b_p)

    # Lookahead + Linear params, zero-padded to aligned shapes.
    w_conv = params["w_conv"]                                       # (hdim, 1, context)
    w_la = jnp.zeros((context, 1, Hp), jnp.float32).at[:, 0, :hdim].set(
        jnp.transpose(w_conv[:, 0, :], (1, 0)))
    w_lin_p = jnp.zeros((Hp, Cp), jnp.float32).at[:hdim, :C].set(
        jnp.transpose(params["w_lin"], (1, 0)))
    b_lin_p = jnp.zeros((1, Cp), jnp.float32).at[0, :C].set(params["b_lin"])

    logits_tm = pl.pallas_call(
        lookahead_linear_kernel,
        out_shape=jax.ShapeDtypeStruct((T_pad, Np, Cp), jnp.float32),
        grid=(nb, nt),
        in_specs=[
            pl.BlockSpec((Tc, Nb, Hp), lambda b, t: (t, b, 0)),
            pl.BlockSpec((Tc, Nb, Hp),
                         lambda b, t, _nt=nt: (jnp.minimum(t + 1, _nt - 1), b, 0)),
            pl.BlockSpec((context, 1, Hp), lambda b, t: (0, 0, 0)),
            pl.BlockSpec((Hp, Cp), lambda b, t: (0, 0)),
            pl.BlockSpec((1, Cp), lambda b, t: (0, 0)),
        ],
        out_specs=pl.BlockSpec((Tc, Nb, Cp), lambda b, t: (t, b, 0)),
        compiler_params=la_cp,
    )(out, out, w_la, w_lin_p, b_lin_p)

    # Slice away padding (small) and return to batch-first layout.
    logits = jnp.transpose(logits_tm[:T, :N, :C], (1, 0, 2))
    return logits, ilens   # olens == ilens (pad_packed_sequence lengths)


# ----------------------------------------------------------------------------
# Pure-JAX reference (for a silent correctness check).
# ----------------------------------------------------------------------------
def ref_forward(params, x, ilens):
    N, T, _ = x.shape
    out = jnp.transpose(x, (1, 0, 2)).astype(jnp.float32)        # (T, N, D)
    mask = (jnp.arange(T)[:, None] < ilens[None, :]).astype(jnp.float32)[:, :, None]
    for (w_ih, w_hh, b_ih, b_hh) in params["lstm"]:
        H = w_hh.shape[1]

        def step(carry, x_t, w_ih=w_ih, w_hh=w_hh, b_ih=b_ih, b_hh=b_hh, H=H):
            h, c = carry
            gates = x_t @ w_ih.T + h @ w_hh.T + b_ih + b_hh
            i, f, g, o = jnp.split(gates, 4, axis=-1)
            c_new = jax.nn.sigmoid(f) * c + jax.nn.sigmoid(i) * jnp.tanh(g)
            h_new = jax.nn.sigmoid(o) * jnp.tanh(c_new)
            return (h_new, c_new), h_new

        init = (jnp.zeros((N, H), jnp.float32), jnp.zeros((N, H), jnp.float32))
        _, ys = jax.lax.scan(step, init, out)
        out = ys * mask
    w_conv = params["w_conv"]
    context = w_conv.shape[2]
    H = out.shape[2]
    ypad = jnp.concatenate([out, jnp.zeros((context - 1, N, H), jnp.float32)], axis=0)
    ahead = sum(ypad[k:k + T] * w_conv[:, 0, k][None, None, :] for k in range(context))
    logits = ahead @ params["w_lin"].T + params["b_lin"]
    return jnp.transpose(logits, (1, 0, 2))


# ----------------------------------------------------------------------------
# Deterministic parameter init (same shapes as the PyTorch module).
# ----------------------------------------------------------------------------
def init_params(key, idim, hdim, n_layers, num_classes, context):
    n_keys = 4 * n_layers + 3
    keys = jax.random.split(key, n_keys)
    ki = 0
    lstm = []
    din = idim
    s = hdim ** -0.5
    for _ in range(n_layers):
        w_ih = jax.random.uniform(keys[ki], (4 * hdim, din), jnp.float32, -s, s); ki += 1
        w_hh = jax.random.uniform(keys[ki], (4 * hdim, hdim), jnp.float32, -s, s); ki += 1
        b_ih = jax.random.uniform(keys[ki], (4 * hdim,), jnp.float32, -s, s); ki += 1
        b_hh = jax.random.uniform(keys[ki], (4 * hdim,), jnp.float32, -s, s); ki += 1
        lstm.append((w_ih, w_hh, b_ih, b_hh))
        din = hdim
    sc = context ** -0.5
    w_conv = jax.random.uniform(keys[ki], (hdim, 1, context), jnp.float32, -sc, sc); ki += 1
    sl = hdim ** -0.5
    w_lin = jax.random.uniform(keys[ki], (num_classes, hdim), jnp.float32, -sl, sl); ki += 1
    b_lin = jax.random.uniform(keys[ki], (num_classes,), jnp.float32, -sl, sl)
    return {"lstm": lstm, "w_conv": w_conv, "w_lin": w_lin, "b_lin": b_lin}


if __name__ == "__main__":
    N, T = 2, 8
    idim, hdim, n_layers, num_classes, context = 64, 32, 2, 16, 5

    key = jax.random.PRNGKey(0)
    kp, kx = jax.random.split(key)
    params = init_params(kp, idim, hdim, n_layers, num_classes, context)
    x = jax.random.normal(kx, (N, T, idim), jnp.float32)
    ilens = jnp.array([T, T - 2], dtype=jnp.int32)  # sorted descending; max == T

    # time_chunk=4 deliberately exercises the multi-chunk path (h/c carry across
    # chunks + the lookahead halo block) at these tiny test shapes.
    fwd = jax.jit(functools.partial(lstm_row_conv_forward, time_chunk=4))
    logits, olens = fwd(params, x, ilens)
    logits = jax.block_until_ready(logits)

    assert logits.shape == (N, T, num_classes)
    ref = ref_forward(params, x, ilens)
    assert jnp.allclose(logits, ref, rtol=1e-3, atol=1e-3)
    assert bool(jnp.all(olens == ilens))
    print("KERNEL_OK")
</pallas_src>

<mosaic_0001>
module attributes {stable_mosaic.version = 11 : i64} {
  func.func @lstm_layer_kernel(%arg0: i32, %arg1: i32, %arg2: memref<8x1xi32, #tpu.memory_space<vmem>>, %arg3: memref<4x8x128xf32, #tpu.memory_space<vmem>>, %arg4: memref<128x512xf32, #tpu.memory_space<vmem>>, %arg5: memref<128x512xf32, #tpu.memory_space<vmem>>, %arg6: memref<1x512xf32, #tpu.memory_space<vmem>>, %arg7: memref<4x8x128xf32, #tpu.memory_space<vmem>>, %arg8: memref<4x8x512xf32, #tpu.memory_space<vmem>>, %arg9: memref<8x128xf32, #tpu.memory_space<vmem>>, %arg10: memref<8x128xf32, #tpu.memory_space<vmem>>) attributes {dimension_semantics = [#tpu.dimension_semantics<parallel>, #tpu.dimension_semantics<arbitrary>], iteration_bounds = array<i64: 1, 2>, scalar_prefetch = 0 : i64, scratch_operands = 3 : i64, tpu.core_type = #tpu.core_type<tc>, window_params = [{transform_indices = @transform_0, window_bounds = array<i64: 8, 1>}, {transform_indices = @transform_1, window_bounds = array<i64: 4, 8, 128>}, {pipeline_mode = #tpu.pipeline_mode<synchronous>, transform_indices = @transform_2, window_bounds = array<i64: 128, 512>}, {pipeline_mode = #tpu.pipeline_mode<synchronous>, transform_indices = @transform_3, window_bounds = array<i64: 128, 512>}, {pipeline_mode = #tpu.pipeline_mode<synchronous>, transform_indices = @transform_4, window_bounds = array<i64: 1, 512>}, {transform_indices = @transform_5, window_bounds = array<i64: 4, 8, 128>}]} {
    %c0_i32 = arith.constant 0 : i32
    %0 = arith.cmpi eq, %arg1, %c0_i32 : i32
    %1 = arith.extui %0 : i1 to i32
    %c0_i32_0 = arith.constant 0 : i32
    %2 = arith.cmpi ne, %1, %c0_i32_0 : i32
    scf.if %2 {
      %cst_60 = arith.constant 0.000000e+00 : f32
      %183 = vector.broadcast %cst_60 : f32 to vector<8x128xf32>
      %c0_61 = arith.constant 0 : index
      %c0_62 = arith.constant 0 : index
      %184 = vector.load %arg9[%c0_61, %c0_62] : memref<8x128xf32, #tpu.memory_space<vmem>>, vector<8x128xf32>
      tpu.vector_store %arg9[%c0_61, %c0_62], %183 {strides = array<i32>} : memref<8x128xf32, #tpu.memory_space<vmem>>, vector<8x128xf32>,
      %cst_63 = arith.constant 0.000000e+00 : f32
      %185 = vector.broadcast %cst_63 : f32 to vector<8x128xf32>
      %c0_64 = arith.constant 0 : index
      %c0_65 = arith.constant 0 : index
      %186 = vector.load %arg10[%c0_64, %c0_65] : memref<8x128xf32, #tpu.memory_space<vmem>>, vector<8x128xf32>
      tpu.vector_store %arg10[%c0_64, %c0_65], %185 {strides = array<i32>} : memref<8x128xf32, #tpu.memory_space<vmem>>, vector<8x128xf32>,
    } else {
    }
    %c0 = arith.constant 0 : index
    %c0_1 = arith.constant 0 : index
    %c0_2 = arith.constant 0 : index
    %3 = vector.load %arg3[%c0, %c0_1, %c0_2] : memref<4x8x128xf32, #tpu.memory_space<vmem>>, vector<4x8x128xf32>
    %4 = vector.shape_cast %3 : vector<4x8x128xf32> to vector<32x128xf32>
    %c0_3 = arith.constant 0 : index
    %c0_4 = arith.constant 0 : index
    %5 = vector.load %arg4[%c0_3, %c0_4] : memref<128x512xf32, #tpu.memory_space<vmem>>, vector<128x512xf32>
    %cst = arith.constant dense<0.000000e+00> : vector<32x512xf32>
    %6 = tpu.matmul %4, %5, %cst {dimension_numbers = #tpu.dot_dimension_numbers<[1], [0], [0], [1], [0, 0, 1, 1], [], []>} : vector<32x128xf32>, vector<128x512xf32>, vector<32x512xf32> -> vector<32x512xf32>
    %c0_5 = arith.constant 0 : index
    %c0_6 = arith.constant 0 : index
    %7 = vector.load %arg6[%c0_5, %c0_6] : memref<1x512xf32, #tpu.memory_space<vmem>>, vector<1x512xf32>
    %8 = vector.broadcast %7 : vector<1x512xf32> to vector<32x512xf32>
    %9 = arith.addf %6, %8 : vector<32x512xf32>
    %10 = vector.shape_cast %9 : vector<32x512xf32> to vector<4x8x512xf32>
    %c0_7 = arith.constant 0 : index
    %c0_8 = arith.constant 0 : index
    %c0_9 = arith.constant 0 : index
    %11 = vector.load %arg8[%c0_7, %c0_8, %c0_9] : memref<4x8x512xf32, #tpu.memory_space<vmem>>, vector<4x8x512xf32>
    tpu.vector_store %arg8[%c0_7, %c0_8, %c0_9], %10 {strides = array<i32>} : memref<4x8x512xf32, #tpu.memory_space<vmem>>, vector<4x8x512xf32>,
    %c0_10 = arith.constant 0 : index
    %c0_11 = arith.constant 0 : index
    %12 = vector.load %arg5[%c0_10, %c0_11] : memref<128x512xf32, #tpu.memory_space<vmem>>, vector<128x512xf32>
    %c0_12 = arith.constant 0 : index
    %c0_13 = arith.constant 0 : index
    %13 = vector.load %arg2[%c0_12, %c0_13] : memref<8x1xi32, #tpu.memory_space<vmem>>, vector<8x1xi32>
    %c4_i32 = arith.constant 4 : i32
    %14 = arith.muli %arg1, %c4_i32 : i32
    %c0_14 = arith.constant 0 : index
    %c0_15 = arith.constant 0 : index
    %15 = vector.load %arg9[%c0_14, %c0_15] : memref<8x128xf32, #tpu.memory_space<vmem>>, vector<8x128xf32>
    %c0_16 = arith.constant 0 : index
    %c0_17 = arith.constant 0 : index
    %16 = vector.load %arg10[%c0_16, %c0_17] : memref<8x128xf32, #tpu.memory_space<vmem>>, vector<8x128xf32>
    %c0_i32_18 = arith.constant 0 : i32
    %17 = arith.index_cast %c0_i32_18 : i32 to index
    %c0_19 = arith.constant 0 : index
    %c0_20 = arith.constant 0 : index
    %18 = vector.load %arg8[%17, %c0_19, %c0_20] : memref<4x8x512xf32, #tpu.memory_space<vmem>>, vector<1x8x512xf32>
    %19 = vector.shape_cast %18 : vector<1x8x512xf32> to vector<8x512xf32>
    %cst_21 = arith.constant dense<0.000000e+00> : vector<8x512xf32>
    %20 = tpu.matmul %15, %12, %cst_21 {dimension_numbers = #tpu.dot_dimension_numbers<[1], [0], [0], [1], [0, 0, 1, 1], [], []>} : vector<8x128xf32>, vector<128x512xf32>, vector<8x512xf32> -> vector<8x512xf32>
    %21 = arith.addf %19, %20 : vector<8x512xf32>
    %22 = vector.extract_strided_slice %21 {offsets = [0, 0], sizes = [8, 128], strides = [1, 1]} : vector<8x512xf32> to vector<8x128xf32>
    %23 = arith.negf %22 : vector<8x128xf32>
    %24 = math.exp %23 : vector<8x128xf32>
    %cst_22 = arith.constant 1.000000e+00 : f32
    %25 = vector.broadcast %cst_22 : f32 to vector<8x128xf32>
    %26 = arith.addf %25, %24 : vector<8x128xf32>
    %27 = arith.divf %25, %26 : vector<8x128xf32>
    %28 = vector.extract_strided_slice %21 {offsets = [0, 128], sizes = [8, 128], strides = [1, 1]} : vector<8x512xf32> to vector<8x128xf32>
    %29 = arith.negf %28 : vector<8x128xf32>
    %30 = math.exp %29 : vector<8x128xf32>
    %cst_23 = arith.constant 1.000000e+00 : f32
    %31 = vector.broadcast %cst_23 : f32 to vector<8x128xf32>
    %32 = arith.addf %31, %30 : vector<8x128xf32>
    %33 = arith.divf %31, %32 : vector<8x128xf32>
    %34 = vector.extract_strided_slice %21 {offsets = [0, 256], sizes = [8, 128], strides = [1, 1]} : vector<8x512xf32> to vector<8x128xf32>
    %35 = math.tanh %34 : vector<8x128xf32>
    %36 = vector.extract_strided_slice %21 {offsets = [0, 384], sizes = [8, 128], strides = [1, 1]} : vector<8x512xf32> to vector<8x128xf32>
    %37 = arith.negf %36 : vector<8x128xf32>
    %38 = math.exp %37 : vector<8x128xf32>
    %cst_24 = arith.constant 1.000000e+00 : f32
    %39 = vector.broadcast %cst_24 : f32 to vector<8x128xf32>
    %40 = arith.addf %39, %38 : vector<8x128xf32>
    %41 = arith.divf %39, %40 : vector<8x128xf32>
    %42 = arith.mulf %33, %16 : vector<8x128xf32>
    %43 = arith.mulf %27, %35 : vector<8x128xf32>
    %44 = arith.addf %42, %43 : vector<8x128xf32>
    %45 = math.tanh %44 : vector<8x128xf32>
    %46 = arith.mulf %41, %45 : vector<8x128xf32>
    %47 = arith.addi %14, %c0_i32_18 : i32
    %48 = vector.broadcast %47 : i32 to vector<8x1xi32>
    %49 = arith.cmpi sgt, %13, %48 : vector<8x1xi32>
    %cst_25 = arith.constant 0.000000e+00 : f32
    %50 = vector.shape_cast %49 : vector<8x1xi1> to vector<8x1xi1>
    %51 = vector.broadcast %50 : vector<8x1xi1> to vector<8x128xi1>
    %52 = vector.broadcast %cst_25 : f32 to vector<8x128xf32>
    %53 = arith.select %51, %46, %52 : vector<8x128xi1>, vector<8x128xf32>
    %54 = arith.index_cast %c0_i32_18 : i32 to index
    %c0_26 = arith.constant 0 : index
    %c0_27 = arith.constant 0 : index
    %55 = vector.load %arg7[%54, %c0_26, %c0_27] : memref<4x8x128xf32, #tpu.memory_space<vmem>>, vector<1x8x128xf32>
    %56 = vector.shape_cast %55 : vector<1x8x128xf32> to vector<8x128xf32>
    %57 = vector.shape_cast %53 : vector<8x128xf32> to vector<1x8x128xf32>
    tpu.vector_store %arg7[%54, %c0_26, %c0_27], %57 {strides = array<i32>} : memref<4x8x128xf32, #tpu.memory_space<vmem>>, vector<1x8x128xf32>,
    %c1_i32 = arith.constant 1 : i32
    %58 = arith.index_cast %c1_i32 : i32 to index
    %c0_28 = arith.constant 0 : index
    %c0_29 = arith.constant 0 : index
    %59 = vector.load %arg8[%58, %c0_28, %c0_29] : memref<4x8x512xf32, #tpu.memory_space<vmem>>, vector<1x8x512xf32>
    %60 = vector.shape_cast %59 : vector<1x8x512xf32> to vector<8x512xf32>
    %cst_30 = arith.constant dense<0.000000e+00> : vector<8x512xf32>
    %61 = tpu.matmul %46, %12, %cst_30 {dimension_numbers = #tpu.dot_dimension_numbers<[1], [0], [0], [1], [0, 0, 1, 1], [], []>} : vector<8x128xf32>, vector<128x512xf32>, vector<8x512xf32> -> vector<8x512xf32>
    %62 = arith.addf %60, %61 : vector<8x512xf32>
    %63 = vector.extract_strided_slice %62 {offsets = [0, 0], sizes = [8, 128], strides = [1, 1]} : vector<8x512xf32> to vector<8x128xf32>
    %64 = arith.negf %63 : vector<8x128xf32>
    %65 = math.exp %64 : vector<8x128xf32>
    %cst_31 = arith.constant 1.000000e+00 : f32
    %66 = vector.broadcast %cst_31 : f32 to vector<8x128xf32>
    %67 = arith.addf %66, %65 : vector<8x128xf32>
    %68 = arith.divf %66, %67 : vector<8x128xf32>
    %69 = vector.extract_strided_slice %62 {offsets = [0, 128], sizes = [8, 128], strides = [1, 1]} : vector<8x512xf32> to vector<8x128xf32>
    %70 = arith.negf %69 : vector<8x128xf32>
    %71 = math.exp %70 : vector<8x128xf32>
    %cst_32 = arith.constant 1.000000e+00 : f32
    %72 = vector.broadcast %cst_32 : f32 to vector<8x128xf32>
    %73 = arith.addf %72, %71 : vector<8x128xf32>
    %74 = arith.divf %72, %73 : vector<8x128xf32>
    %75 = vector.extract_strided_slice %62 {offsets = [0, 256], sizes = [8, 128], strides = [1, 1]} : vector<8x512xf32> to vector<8x128xf32>
    %76 = math.tanh %75 : vector<8x128xf32>
    %77 = vector.extract_strided_slice %62 {offsets = [0, 384], sizes = [8, 128], strides = [1, 1]} : vector<8x512xf32> to vector<8x128xf32>
    %78 = arith.negf %77 : vector<8x128xf32>
    %79 = math.exp %78 : vector<8x128xf32>
    %cst_33 = arith.constant 1.000000e+00 : f32
    %80 = vector.broadcast %cst_33 : f32 to vector<8x128xf32>
    %81 = arith.addf %80, %79 : vector<8x128xf32>
    %82 = arith.divf %80, %81 : vector<8x128xf32>
    %83 = arith.mulf %74, %44 : vector<8x128xf32>
    %84 = arith.mulf %68, %76 : vector<8x128xf32>
    %85 = arith.addf %83, %84 : vector<8x128xf32>
    %86 = math.tanh %85 : vector<8x128xf32>
    %87 = arith.mulf %82, %86 : vector<8x128xf32>
    %88 = arith.addi %14, %c1_i32 : i32
    %89 = vector.broadcast %88 : i32 to vector<8x1xi32>
    %90 = arith.cmpi sgt, %13, %89 : vector<8x1xi32>
    %cst_34 = arith.constant 0.000000e+00 : f32
    %91 = vector.shape_cast %90 : vector<8x1xi1> to vector<8x1xi1>
    %92 = vector.broadcast %91 : vector<8x1xi1> to vector<8x128xi1>
    %93 = vector.broadcast %cst_34 : f32 to vector<8x128xf32>
    %94 = arith.select %92, %87, %93 : vector<8x128xi1>, vector<8x128xf32>
    %95 = arith.index_cast %c1_i32 : i32 to index
    %c0_35 = arith.constant 0 : index
    %c0_36 = arith.constant 0 : index
    %96 = vector.load %arg7[%95, %c0_35, %c0_36] : memref<4x8x128xf32, #tpu.memory_space<vmem>>, vector<1x8x128xf32>
    %97 = vector.shape_cast %96 : vector<1x8x128xf32> to vector<8x128xf32>
    %98 = vector.shape_cast %94 : vector<8x128xf32> to vector<1x8x128xf32>
    tpu.vector_store %arg7[%95, %c0_35, %c0_36], %98 {strides = array<i32>} : memref<4x8x128xf32, #tpu.memory_space<vmem>>, vector<1x8x128xf32>,
    %c2_i32 = arith.constant 2 : i32
    %99 = arith.index_cast %c2_i32 : i32 to index
    %c0_37 = arith.constant 0 : index
    %c0_38 = arith.constant 0 : index
    %100 = vector.load %arg8[%99, %c0_37, %c0_38] : memref<4x8x512xf32, #tpu.memory_space<vmem>>, vector<1x8x512xf32>
    %101 = vector.shape_cast %100 : vector<1x8x512xf32> to vector<8x512xf32>
    %cst_39 = arith.constant dense<0.000000e+00> : vector<8x512xf32>
    %102 = tpu.matmul %87, %12, %cst_39 {dimension_numbers = #tpu.dot_dimension_numbers<[1], [0], [0], [1], [0, 0, 1, 1], [], []>} : vector<8x128xf32>, vector<128x512xf32>, vector<8x512xf32> -> vector<8x512xf32>
    %103 = arith.addf %101, %102 : vector<8x512xf32>
    %104 = vector.extract_strided_slice %103 {offsets = [0, 0], sizes = [8, 128], strides = [1, 1]} : vector<8x512xf32> to vector<8x128xf32>
    %105 = arith.negf %104 : vector<8x128xf32>
    %106 = math.exp %105 : vector<8x128xf32>
    %cst_40 = arith.constant 1.000000e+00 : f32
    %107 = vector.broadcast %cst_40 : f32 to vector<8x128xf32>
    %108 = arith.addf %107, %106 : vector<8x128xf32>
    %109 = arith.divf %107, %108 : vector<8x128xf32>
    %110 = vector.extract_strided_slice %103 {offsets = [0, 128], sizes = [8, 128], strides = [1, 1]} : vector<8x512xf32> to vector<8x128xf32>
    %111 = arith.negf %110 : vector<8x128xf32>
    %112 = math.exp %111 : vector<8x128xf32>
    %cst_41 = arith.constant 1.000000e+00 : f32
    %113 = vector.broadcast %cst_41 : f32 to vector<8x128xf32>
    %114 = arith.addf %113, %112 : vector<8x128xf32>
    %115 = arith.divf %113, %114 : vector<8x128xf32>
    %116 = vector.extract_strided_slice %103 {offsets = [0, 256], sizes = [8, 128], strides = [1, 1]} : vector<8x512xf32> to vector<8x128xf32>
    %117 = math.tanh %116 : vector<8x128xf32>
    %118 = vector.extract_strided_slice %103 {offsets = [0, 384], sizes = [8, 128], strides = [1, 1]} : vector<8x512xf32> to vector<8x128xf32>
    %119 = arith.negf %118 : vector<8x128xf32>
    %120 = math.exp %119 : vector<8x128xf32>
    %cst_42 = arith.constant 1.000000e+00 : f32
    %121 = vector.broadcast %cst_42 : f32 to vector<8x128xf32>
    %122 = arith.addf %121, %120 : vector<8x128xf32>
    %123 = arith.divf %121, %122 : vector<8x128xf32>
    %124 = arith.mulf %115, %85 : vector<8x128xf32>
    %125 = arith.mulf %109, %117 : vector<8x128xf32>
    %126 = arith.addf %124, %125 : vector<8x128xf32>
    %127 = math.tanh %126 : vector<8x128xf32>
    %128 = arith.mulf %123, %127 : vector<8x128xf32>
    %129 = arith.addi %14, %c2_i32 : i32
    %130 = vector.broadcast %129 : i32 to vector<8x1xi32>
    %131 = arith.cmpi sgt, %13, %130 : vector<8x1xi32>
    %cst_43 = arith.constant 0.000000e+00 : f32
    %132 = vector.shape_cast %131 : vector<8x1xi1> to vector<8x1xi1>
    %133 = vector.broadcast %132 : vector<8x1xi1> to vector<8x128xi1>
    %134 = vector.broadcast %cst_43 : f32 to vector<8x128xf32>
    %135 = arith.select %133, %128, %134 : vector<8x128xi1>, vector<8x128xf32>
    %136 = arith.index_cast %c2_i32 : i32 to index
    %c0_44 = arith.constant 0 : index
    %c0_45 = arith.constant 0 : index
    %137 = vector.load %arg7[%136, %c0_44, %c0_45] : memref<4x8x128xf32, #tpu.memory_space<vmem>>, vector<1x8x128xf32>
    %138 = vector.shape_cast %137 : vector<1x8x128xf32> to vector<8x128xf32>
    %139 = vector.shape_cast %135 : vector<8x128xf32> to vector<1x8x128xf32>
    tpu.vector_store %arg7[%136, %c0_44, %c0_45], %139 {strides = array<i32>} : memref<4x8x128xf32, #tpu.memory_space<vmem>>, vector<1x8x128xf32>,
    %c3_i32 = arith.constant 3 : i32
    %140 = arith.index_cast %c3_i32 : i32 to index
    %c0_46 = arith.constant 0 : index
    %c0_47 = arith.constant 0 : index
    %141 = vector.load %arg8[%140, %c0_46, %c0_47] : memref<4x8x512xf32, #tpu.memory_space<vmem>>, vector<1x8x512xf32>
    %142 = vector.shape_cast %141 : vector<1x8x512xf32> to vector<8x512xf32>
    %cst_48 = arith.constant dense<0.000000e+00> : vector<8x512xf32>
    %143 = tpu.matmul %128, %12, %cst_48 {dimension_numbers = #tpu.dot_dimension_numbers<[1], [0], [0], [1], [0, 0, 1, 1], [], []>} : vector<8x128xf32>, vector<128x512xf32>, vector<8x512xf32> -> vector<8x512xf32>
    %144 = arith.addf %142, %143 : vector<8x512xf32>
    %145 = vector.extract_strided_slice %144 {offsets = [0, 0], sizes = [8, 128], strides = [1, 1]} : vector<8x512xf32> to vector<8x128xf32>
    %146 = arith.negf %145 : vector<8x128xf32>
    %147 = math.exp %146 : vector<8x128xf32>
    %cst_49 = arith.constant 1.000000e+00 : f32
    %148 = vector.broadcast %cst_49 : f32 to vector<8x128xf32>
    %149 = arith.addf %148, %147 : vector<8x128xf32>
    %150 = arith.divf %148, %149 : vector<8x128xf32>
    %151 = vector.extract_strided_slice %144 {offsets = [0, 128], sizes = [8, 128], strides = [1, 1]} : vector<8x512xf32> to vector<8x128xf32>
    %152 = arith.negf %151 : vector<8x128xf32>
    %153 = math.exp %152 : vector<8x128xf32>
    %cst_50 = arith.constant 1.000000e+00 : f32
    %154 = vector.broadcast %cst_50 : f32 to vector<8x128xf32>
    %155 = arith.addf %154, %153 : vector<8x128xf32>
    %156 = arith.divf %154, %155 : vector<8x128xf32>
    %157 = vector.extract_strided_slice %144 {offsets = [0, 256], sizes = [8, 128], strides = [1, 1]} : vector<8x512xf32> to vector<8x128xf32>
    %158 = math.tanh %157 : vector<8x128xf32>
    %159 = vector.extract_strided_slice %144 {offsets = [0, 384], sizes = [8, 128], strides = [1, 1]} : vector<8x512xf32> to vector<8x128xf32>
    %160 = arith.negf %159 : vector<8x128xf32>
    %161 = math.exp %160 : vector<8x128xf32>
    %cst_51 = arith.constant 1.000000e+00 : f32
    %162 = vector.broadcast %cst_51 : f32 to vector<8x128xf32>
    %163 = arith.addf %162, %161 : vector<8x128xf32>
    %164 = arith.divf %162, %163 : vector<8x128xf32>
    %165 = arith.mulf %156, %126 : vector<8x128xf32>
    %166 = arith.mulf %150, %158 : vector<8x128xf32>
    %167 = arith.addf %165, %166 : vector<8x128xf32>
    %168 = math.tanh %167 : vector<8x128xf32>
    %169 = arith.mulf %164, %168 : vector<8x128xf32>
    %170 = arith.addi %14, %c3_i32 : i32
    %171 = vector.broadcast %170 : i32 to vector<8x1xi32>
    %172 = arith.cmpi sgt, %13, %171 : vector<8x1xi32>
    %cst_52 = arith.constant 0.000000e+00 : f32
    %173 = vector.shape_cast %172 : vector<8x1xi1> to vector<8x1xi1>
    %174 = vector.broadcast %173 : vector<8x1xi1> to vector<8x128xi1>
    %175 = vector.broadcast %cst_52 : f32 to vector<8x128xf32>
    %176 = arith.select %174, %169, %175 : vector<8x128xi1>, vector<8x128xf32>
    %177 = arith.index_cast %c3_i32 : i32 to index
    %c0_53 = arith.constant 0 : index
    %c0_54 = arith.constant 0 : index
    %178 = vector.load %arg7[%177, %c0_53, %c0_54] : memref<4x8x128xf32, #tpu.memory_space<vmem>>, vector<1x8x128xf32>
    %179 = vector.shape_cast %178 : vector<1x8x128xf32> to vector<8x128xf32>
    %180 = vector.shape_cast %176 : vector<8x128xf32> to vector<1x8x128xf32>
    tpu.vector_store %arg7[%177, %c0_53, %c0_54], %180 {strides = array<i32>} : memref<4x8x128xf32, #tpu.memory_space<vmem>>, vector<1x8x128xf32>,
    %c4_i32_55 = arith.constant 4 : i32
    %c0_56 = arith.constant 0 : index
    %c0_57 = arith.constant 0 : index
    %181 = vector.load %arg9[%c0_56, %c0_57] : memref<8x128xf32, #tpu.memory_space<vmem>>, vector<8x128xf32>
    tpu.vector_store %arg9[%c0_56, %c0_57], %169 {strides = array<i32>} : memref<8x128xf32, #tpu.memory_space<vmem>>, vector<8x128xf32>,
    %c0_58 = arith.constant 0 : index
    %c0_59 = arith.constant 0 : index
    %182 = vector.load %arg10[%c0_58, %c0_59] : memref<8x128xf32, #tpu.memory_space<vmem>>, vector<8x128xf32>
    tpu.vector_store %arg10[%c0_58, %c0_59], %167 {strides = array<i32>} : memref<8x128xf32, #tpu.memory_space<vmem>>, vector<8x128xf32>,
    return
  }
  func.func @transform_0(%arg0: i32, %arg1: i32) -> (i32, i32) {
    %c0_i32 = arith.constant 0 : i32
    %c0_i32_0 = arith.constant 0 : i32
    return %arg0, %c0_i32 : i32, i32
  }
  func.func @transform_1(%arg0: i32, %arg1: i32) -> (i32, i32, i32) {
    %c0_i32 = arith.constant 0 : i32
    %c0_i32_0 = arith.constant 0 : i32
    return %arg1, %arg0, %c0_i32 : i32, i32, i32
  }
  func.func @transform_2(%arg0: i32, %arg1: i32) -> (i32, i32) {
    %c0_i32 = arith.constant 0 : i32
    %c0_i32_0 = arith.constant 0 : i32
    %c0_i32_1 = arith.constant 0 : i32
    return %c0_i32, %c0_i32_0 : i32, i32
  }
  func.func @transform_3(%arg0: i32, %arg1: i32) -> (i32, i32) {
    %c0_i32 = arith.constant 0 : i32
    %c0_i32_0 = arith.constant 0 : i32
    %c0_i32_1 = arith.constant 0 : i32
    return %c0_i32, %c0_i32_0 : i32, i32
  }
  func.func @transform_4(%arg0: i32, %arg1: i32) -> (i32, i32) {
    %c0_i32 = arith.constant 0 : i32
    %c0_i32_0 = arith.constant 0 : i32
    %c0_i32_1 = arith.constant 0 : i32
    return %c0_i32, %c0_i32_0 : i32, i32
  }
  func.func @transform_5(%arg0: i32, %arg1: i32) -> (i32, i32, i32) {
    %c0_i32 = arith.constant 0 : i32
    %c0_i32_0 = arith.constant 0 : i32
    return %arg1, %arg0, %c0_i32 : i32, i32, i32
  }
}

module attributes {stable_mosaic.version = 11 : i64} {
  func.func @lookahead_linear_kernel(%arg0: i32, %arg1: i32, %arg2: memref<4x8x128xf32, #tpu.memory_space<vmem>>, %arg3: memref<4x8x128xf32, #tpu.memory_space<vmem>>, %arg4: memref<5x1x128xf32, #tpu.memory_space<vmem>>, %arg5: memref<128x128xf32, #tpu.memory_space<vmem>>, %arg6: memref<1x128xf32, #tpu.memory_space<vmem>>, %arg7: memref<4x8x128xf32, #tpu.memory_space<vmem>>) attributes {dimension_semantics = [#tpu.dimension_semantics<parallel>, #tpu.dimension_semantics<parallel>], iteration_bounds = array<i64: 1, 2>, scalar_prefetch = 0 : i64, scratch_operands = 0 : i64, tpu.core_type = #tpu.core_type<tc>, window_params = [{transform_indices = @transform_0, window_bounds = array<i64: 4, 8, 128>}, {transform_indices = @transform_1, window_bounds = array<i64: 4, 8, 128>}, {pipeline_mode = #tpu.pipeline_mode<synchronous>, transform_indices = @transform_2, window_bounds = array<i64: 5, 1, 128>}, {pipeline_mode = #tpu.pipeline_mode<synchronous>, transform_indices = @transform_3, window_bounds = array<i64: 128, 128>}, {pipeline_mode = #tpu.pipeline_mode<synchronous>, transform_indices = @transform_4, window_bounds = array<i64: 1, 128>}, {transform_indices = @transform_5, window_bounds = array<i64: 4, 8, 128>}]} {
    %c1_i32 = arith.constant 1 : i32
    %0 = arith.cmpi eq, %arg1, %c1_i32 : i32
    %c0 = arith.constant 0 : index
    %c0_0 = arith.constant 0 : index
    %c0_1 = arith.constant 0 : index
    %1 = vector.load %arg2[%c0, %c0_0, %c0_1] : memref<4x8x128xf32, #tpu.memory_space<vmem>>, vector<4x8x128xf32>
    %c0_2 = arith.constant 0 : index
    %c0_3 = arith.constant 0 : index
    %c0_4 = arith.constant 0 : index
    %2 = vector.load %arg3[%c0_2, %c0_3, %c0_4] : memref<4x8x128xf32, #tpu.memory_space<vmem>>, vector<4x8x128xf32>
    %cst = arith.constant 0.000000e+00 : f32
    %3 = vector.broadcast %cst : f32 to vector<4x8x128xf32>
    %4 = arith.select %0, %3, %2 : vector<4x8x128xf32>
    %5 = tpu.concatenate %1, %4 in 0 : vector<4x8x128xf32>, vector<4x8x128xf32> -> vector<8x8x128xf32>
    %6 = vector.extract_strided_slice %5 {offsets = [0, 0, 0], sizes = [4, 8, 128], strides = [1, 1, 1]} : vector<8x8x128xf32> to vector<4x8x128xf32>
    %c0_5 = arith.constant 0 : index
    %c0_6 = arith.constant 0 : index
    %c0_7 = arith.constant 0 : index
    %7 = vector.load %arg4[%c0_5, %c0_6, %c0_7] : memref<5x1x128xf32, #tpu.memory_space<vmem>>, vector<1x1x128xf32>
    %8 = vector.shape_cast %7 : vector<1x1x128xf32> to vector<1x128xf32>
    %9 = vector.shape_cast %8 : vector<1x128xf32> to vector<1x1x128xf32>
    %10 = vector.broadcast %9 : vector<1x1x128xf32> to vector<4x8x128xf32>
    %11 = arith.mulf %6, %10 : vector<4x8x128xf32>
    %12 = vector.extract_strided_slice %5 {offsets = [1, 0, 0], sizes = [4, 8, 128], strides = [1, 1, 1]} : vector<8x8x128xf32> to vector<4x8x128xf32>
    %c1 = arith.constant 1 : index
    %c0_8 = arith.constant 0 : index
    %c0_9 = arith.constant 0 : index
    %13 = vector.load %arg4[%c1, %c0_8, %c0_9] : memref<5x1x128xf32, #tpu.memory_space<vmem>>, vector<1x1x128xf32>
    %14 = vector.shape_cast %13 : vector<1x1x128xf32> to vector<1x128xf32>
    %15 = vector.shape_cast %14 : vector<1x128xf32> to vector<1x1x128xf32>
    %16 = vector.broadcast %15 : vector<1x1x128xf32> to vector<4x8x128xf32>
    %17 = arith.mulf %12, %16 : vector<4x8x128xf32>
    %18 = arith.addf %11, %17 : vector<4x8x128xf32>
    %19 = vector.extract_strided_slice %5 {offsets = [2, 0, 0], sizes = [4, 8, 128], strides = [1, 1, 1]} : vector<8x8x128xf32> to vector<4x8x128xf32>
    %c2 = arith.constant 2 : index
    %c0_10 = arith.constant 0 : index
    %c0_11 = arith.constant 0 : index
    %20 = vector.load %arg4[%c2, %c0_10, %c0_11] : memref<5x1x128xf32, #tpu.memory_space<vmem>>, vector<1x1x128xf32>
    %21 = vector.shape_cast %20 : vector<1x1x128xf32> to vector<1x128xf32>
    %22 = vector.shape_cast %21 : vector<1x128xf32> to vector<1x1x128xf32>
    %23 = vector.broadcast %22 : vector<1x1x128xf32> to vector<4x8x128xf32>
    %24 = arith.mulf %19, %23 : vector<4x8x128xf32>
    %25 = arith.addf %18, %24 : vector<4x8x128xf32>
    %26 = vector.extract_strided_slice %5 {offsets = [3, 0, 0], sizes = [4, 8, 128], strides = [1, 1, 1]} : vector<8x8x128xf32> to vector<4x8x128xf32>
    %c3 = arith.constant 3 : index
    %c0_12 = arith.constant 0 : index
    %c0_13 = arith.constant 0 : index
    %27 = vector.load %arg4[%c3, %c0_12, %c0_13] : memref<5x1x128xf32, #tpu.memory_space<vmem>>, vector<1x1x128xf32>
    %28 = vector.shape_cast %27 : vector<1x1x128xf32> to vector<1x128xf32>
    %29 = vector.shape_cast %28 : vector<1x128xf32> to vector<1x1x128xf32>
    %30 = vector.broadcast %29 : vector<1x1x128xf32> to vector<4x8x128xf32>
    %31 = arith.mulf %26, %30 : vector<4x8x128xf32>
    %32 = arith.addf %25, %31 : vector<4x8x128xf32>
    %33 = vector.extract_strided_slice %5 {offsets = [4, 0, 0], sizes = [4, 8, 128], strides = [1, 1, 1]} : vector<8x8x128xf32> to vector<4x8x128xf32>
    %c4 = arith.constant 4 : index
    %c0_14 = arith.constant 0 : index
    %c0_15 = arith.constant 0 : index
    %34 = vector.load %arg4[%c4, %c0_14, %c0_15] : memref<5x1x128xf32, #tpu.memory_space<vmem>>, vector<1x1x128xf32>
    %35 = vector.shape_cast %34 : vector<1x1x128xf32> to vector<1x128xf32>
    %36 = vector.shape_cast %35 : vector<1x128xf32> to vector<1x1x128xf32>
    %37 = vector.broadcast %36 : vector<1x1x128xf32> to vector<4x8x128xf32>
    %38 = arith.mulf %33, %37 : vector<4x8x128xf32>
    %39 = arith.addf %32, %38 : vector<4x8x128xf32>
    %40 = vector.shape_cast %39 : vector<4x8x128xf32> to vector<32x128xf32>
    %c0_16 = arith.constant 0 : index
    %c0_17 = arith.constant 0 : index
    %41 = vector.load %arg5[%c0_16, %c0_17] : memref<128x128xf32, #tpu.memory_space<vmem>>, vector<128x128xf32>
    %cst_18 = arith.constant dense<0.000000e+00> : vector<32x128xf32>
    %42 = tpu.matmul %40, %41, %cst_18 {dimension_numbers = #tpu.dot_dimension_numbers<[1], [0], [0], [1], [0, 0, 1, 1], [], []>} : vector<32x128xf32>, vector<128x128xf32>, vector<32x128xf32> -> vector<32x128xf32>
    %c0_19 = arith.constant 0 : index
    %c0_20 = arith.constant 0 : index
    %43 = vector.load %arg6[%c0_19, %c0_20] : memref<1x128xf32, #tpu.memory_space<vmem>>, vector<1x128xf32>
    %44 = vector.broadcast %43 : vector<1x128xf32> to vector<32x128xf32>
    %45 = arith.addf %42, %44 : vector<32x128xf32>
    %46 = vector.shape_cast %45 : vector<32x128xf32> to vector<4x8x128xf32>
    %c0_21 = arith.constant 0 : index
    %c0_22 = arith.constant 0 : index
    %c0_23 = arith.constant 0 : index
    %47 = vector.load %arg7[%c0_21, %c0_22, %c0_23] : memref<4x8x128xf32, #tpu.memory_space<vmem>>, vector<4x8x128xf32>
    tpu.vector_store %arg7[%c0_21, %c0_22, %c0_23], %46 {strides = array<i32>} : memref<4x8x128xf32, #tpu.memory_space<vmem>>, vector<4x8x128xf32>,
    return
  }
  func.func @transform_0(%arg0: i32, %arg1: i32) -> (i32, i32, i32) {
    %c0_i32 = arith.constant 0 : i32
    %c0_i32_0 = arith.constant 0 : i32
    return %arg1, %arg0, %c0_i32 : i32, i32, i32
  }
  func.func @transform_1(%arg0: i32, %arg1: i32) -> (i32, i32, i32) {
    %c1_i32 = arith.constant 1 : i32
    %0 = arith.addi %arg1, %c1_i32 : i32
    %c1_i32_0 = arith.constant 1 : i32
    %1 = arith.minsi %0, %c1_i32_0 : i32
    %c0_i32 = arith.constant 0 : i32
    %c0_i32_1 = arith.constant 0 : i32
    return %1, %arg0, %c0_i32 : i32, i32, i32
  }
  func.func @transform_2(%arg0: i32, %arg1: i32) -> (i32, i32, i32) {
    %c0_i32 = arith.constant 0 : i32
    %c0_i32_0 = arith.constant 0 : i32
    %c0_i32_1 = arith.constant 0 : i32
    %c0_i32_2 = arith.constant 0 : i32
    return %c0_i32, %c0_i32_0, %c0_i32_1 : i32, i32, i32
  }
  func.func @transform_3(%arg0: i32, %arg1: i32) -> (i32, i32) {
    %c0_i32 = arith.constant 0 : i32
    %c0_i32_0 = arith.constant 0 : i32
    %c0_i32_1 = arith.constant 0 : i32
    return %c0_i32, %c0_i32_0 : i32, i32
  }
  func.func @transform_4(%arg0: i32, %arg1: i32) -> (i32, i32) {
    %c0_i32 = arith.constant 0 : i32
    %c0_i32_0 = arith.constant 0 : i32
    %c0_i32_1 = arith.constant 0 : i32
    return %c0_i32, %c0_i32_0 : i32, i32
  }
  func.func @transform_5(%arg0: i32, %arg1: i32) -> (i32, i32, i32) {
    %c0_i32 = arith.constant 0 : i32
    %c0_i32_0 = arith.constant 0 : i32
    return %arg1, %arg0, %c0_i32 : i32, i32, i32
  }
}

</mosaic_0001>

<bundles_post_ra>
// kernel: lstm_row_conv_forward.5
= control target key start
LH: loop header
LB: loop body
LE: loop exit
PB: predicated region body
PF: predicated region fallthrough
CT: control target
= control target key end

     0   :  { %s828_s18 = smov 0   ;;  %s830_s19 = smov 0   ;;  %s962_s0 = inlined_call_operand.vmem [shape: f32[8,8,128], index: 0, kind: input, shape index: {}, may-alias: {0,1}]   ;;  %s963_s1 = inlined_call_operand.vmem [shape: f32[8,8,128], index: 1, kind: input, shape index: {}, may-alias: {0,1}]   ;;  %s964_s2 = inlined_call_operand.vmem [shape: f32[5,1,128], index: 2, kind: input, shape index: {}]   ;;  %s965_s3 = inlined_call_operand.vmem [shape: f32[128,128], index: 3, kind: input, shape index: {}]   ;;  %s966_s4 = inlined_call_operand.vmem [shape: f32[1,128], index: 4, kind: input, shape index: {}]   ;;  %s967_s5 = inlined_call_operand.vmem [shape: f32[8,8,128], index: 5, kind: output, shape index: {}]  }
   0x1   :  { %s832_s20 = smov 0  }
   0x2 LB: > { %s24_s21 = sadd.s32 1, %s792_s19  ;;  %p613_p0 = scmp.ge.s32.totalorder %s796_s20, 1  ;;  %s796_s20 = sphi %s832_s20, %s15_s20   ;;  %s792_s19 = sphi %s830_s19, %s969_s19   ;;  %s788_s18 = sphi %s828_s18, %s968_s18  }
   0x3   : > { %p25_p1 = scmp.ge.s32.totalorder %s24_s21, 2  ;;  %p235_p2 = scmp.lt.s32.totalorder %s796_s20, 3 }
   0x5   : > { %s971_s21 = smov (%p25_p1, %s24_s21), 0  ;;  %p236_p3 = pnand %p613_p0, %p235_p2 }
   0x6   : > { %v404_v0 = vld [vmem:[%s965_s3] sm:$0xff] (!%p236_p3)  ;;  %v405_v1 = vld [vmem:[%s965_s3 + $0x8] sm:$0xff] (!%p236_p3)  ;;  %v406_v2 = vld [vmem:[%s965_s3 + $0x10] sm:$0xff] (!%p236_p3)  ;;  %s614_s28 = sshll.u32 (!%p236_p3), %s788_s18, 2  ;;  %s289_s29 = sadd.s32 (!%p236_p3), 1, %s788_s18 }
   0x7   : > { %239 = sbr.rel (%p236_p3) target bundleno = 258 (0x102), region = 40  ;;  %v690_v3 = vpack.c.bf16 (!%p236_p3), %v405_v1, %v404_v0  ;;  %v407_v4 = vld [vmem:[%s965_s3 + $0x18] sm:$0xff] (!%p236_p3)  ;;  %p281_p4 = scmp.lt.s32.totalorder (!%p236_p3), %s614_s28, 7  ;;  %v408_v6 = vld [vmem:[%s965_s3 + $0x20] sm:$0xff] (!%p236_p3)  ;;  %v409_v7 = vld [vmem:[%s965_s3 + $0x28] sm:$0xff] (!%p236_p3) }
   0x8   : > { %p290_p5 = scmp.lt.s32.totalorder (!%p236_p3), %s289_s29, 1  ;;  %v694_v5 = vpack.c.bf16 (!%p236_p3), %v407_v4, %v406_v2  ;;  %p313_p6 = scmp.eq.s32.totalorder (!%p236_p3), %s788_s18, 1  ;;  %v698_v8 = vpack.c.bf16 (!%p236_p3), %v409_v7, %v408_v6  ;;  %v410_v9 = vld [vmem:[%s965_s3 + $0x30] sm:$0xff] (!%p236_p3)  ;;  %v620_v10 = vld [vmem:[%s964_s2] ss:$0 sm:$0xff] (!%p236_p3)  ;;  %v411_v12 = vld [vmem:[%s965_s3 + $0x38] sm:$0xff] (!%p236_p3) }
   0x9   : > { %691 = vmatprep.subr.bf16.mxu0 (!%p236_p3), %v690_v3  ;;  %722 = vmatprep.subr.bf16.mxu1 (!%p236_p3), %v690_v3  ;;  %v622_v11 = vld [vmem:[%s964_s2 + $0x1] ss:$0 sm:$0xff] (!%p236_p3)  ;;  %v624_v13 = vld [vmem:[%s964_s2 + $0x2] ss:$0 sm:$0xff] (!%p236_p3)  ;;  %v895_v14 = vld [vmem:[%s964_s2 + $0x3] ss:$0 sm:$0xff] (!%p236_p3)  ;;  %v702_v21 = vpack.c.bf16 (!%p236_p3), %v411_v12, %v410_v9 }
   0xa   : > { %693 = vmatpush3.bf16.msra.mxu0 (!%p236_p3), %v690_v3  ;;  %730 = vmatpush3.bf16.msra.mxu1 (!%p236_p3), %v690_v3  ;;  %v412_v23 = vld [vmem:[%s965_s3 + $0x40] sm:$0xff] (!%p236_p3)  ;;  %v413_v24 = vld [vmem:[%s965_s3 + $0x48] sm:$0xff] (!%p236_p3)  ;;  %v414_v32 = vld [vmem:[%s965_s3 + $0x50] sm:$0xff] (!%p236_p3) }
   0xb   : > { %695 = vmatprep.subr.bf16.mxu0 (!%p236_p3), %v694_v5  ;;  %723 = vmatprep.subr.bf16.mxu1 (!%p236_p3), %v694_v5  ;;  %v706_v30 = vpack.c.bf16 (!%p236_p3), %v413_v24, %v412_v23  ;;  %v628_v31 = vld [vmem:[%s964_s2 + $0x4] ss:$0 sm:$0xff] (!%p236_p3)  ;;  %v415_v33 = vld [vmem:[%s965_s3 + $0x58] sm:$0xff] (!%p236_p3)  ;;  %v417_v48 = vld [vmem:[%s965_s3 + $0x68] sm:$0xff] (!%p236_p3) }
   0xc   : > { %v710_v43 = vpack.c.bf16 (!%p236_p3), %v415_v33, %v414_v32  ;;  %v416_v47 = vld [vmem:[%s965_s3 + $0x60] sm:$0xff] (!%p236_p3)  ;;  %v418_v58 = vld [vmem:[%s965_s3 + $0x70] sm:$0xff] (!%p236_p3)  ;;  %v419_v59 = vld [vmem:[%s965_s3 + $0x78] sm:$0xff] (!%p236_p3) }
   0xd   : > { %v714_v56 = vpack.c.bf16 (!%p236_p3), %v417_v48, %v416_v47  ;;  %v718_v2 = vpack.c.bf16 (!%p236_p3), %v419_v59, %v418_v58  ;;  %v629_v9 = vld [vmem:[%s966_s4] ss:$0 sm:$0xff] (!%p236_p3) }
   0xe   : > { %s973_s28 = smov (!%p281_p4, %s614_s28), 7  ;;  %s975_s29 = smov (!%p290_p5, %s289_s29), 1  ;;  %697 = vmatpush3.bf16.msra.mxu0 %v694_v5  ;;  %731 = vmatpush3.bf16.msra.mxu1 %v694_v5 }
   0xf   : > { %s615_s13 = sshll.u32 %s973_s28, 3  ;;  %s616_s27 = sshll.u32 %s975_s29, 2  ;;  %699 = vmatprep.subr.bf16.mxu0 %v698_v8  ;;  %724 = vmatprep.subr.bf16.mxu1 %v698_v8 }
  0x10   : > { %s287_s26 = scalar_lea.vmem %s962_s0, %s615_s13  ;;  %p293_p7 = scmp.lt.s32.totalorder %s616_s27, 7 }
  0x11   : > { %v314_v15 = vld [vmem:[%s287_s26] sm:$0xff]  ;;  %v315_v16 = vld [vmem:[%s287_s26 + $0x8] sm:$0xff]  ;;  %v316_v17 = vld [vmem:[%s287_s26 + $0x10] sm:$0xff]  ;;  %s911_s17 = scalar_select %p313_p6, 0, 255 }
  0x12   : > { %v317_v18 = vld [vmem:[%s287_s26 + $0x18] sm:$0xff]  ;;  %v336_v19 = vmul.f32 %v620_v10, %v314_v15  ;;  %v348_v20 = vmul.f32 %v622_v11, %v315_v16  ;;  %s977_s27 = smov (!%p293_p7, %s616_s27), 7  ;;  %v364_v22 = vmul.f32 %v624_v13, %v316_v17  ;;  %v338_v27 = vmul.f32 %v620_v10, %v316_v17  ;;  %701 = vmatpush3.bf16.msra.mxu0 %v698_v8 }
  0x13   : > { %v380_v26 = vmul.f32 %v895_v14, %v317_v18  ;;  %s617_s12 = sshll.u32 %s977_s27, 3  ;;  %v350_v28 = vmul.f32 %v622_v11, %v317_v18  ;;  %732 = vmatpush3.bf16.msra.mxu1 %v698_v8  ;;  %703 = vmatprep.subr.bf16.mxu0 %v702_v21  ;;  %v337_v34 = vmul.f32 %v620_v10, %v315_v16 }
  0x14   : > { %v352_v25 = vadd.f32 %v348_v20, %v336_v19  ;;  %s907_s16 = scalar_lea.vmem %s963_s1, %s617_s12  ;;  %725 = vmatprep.subr.bf16.mxu1 %v702_v21  ;;  %v349_v35 = vmul.f32 %v622_v11, %v316_v17  ;;  %v339_v39 = vmul.f32 %v620_v10, %v317_v18  ;;  %v365_v51 = vmul.f32 %v624_v13, %v317_v18 }
  0x15   : > { %v764_v37 = vld [vmem:[%s907_s16] sm:%s911_s17]  ;;  %v354_v38 = vadd.f32 %v350_v28, %v338_v27  ;;  %v767_v42 = vld [vmem:[%s907_s16 + $0x8] sm:%s911_s17] }
  0x16   : > { %v368_v29 = vadd.f32 %v364_v22, %v352_v25  ;;  %705 = vmatpush3.bf16.msra.mxu0 %v702_v21  ;;  %v351_v40 = vmul.f32 %v764_v37, %v622_v11  ;;  %v396_v41 = vmul.f32 %v764_v37, %v628_v31  ;;  %v770_v44 = vld [vmem:[%s907_s16 + $0x10] sm:%s911_s17]  ;;  %v366_v45 = vmul.f32 %v764_v37, %v624_v13  ;;  %v773_v1 = vld [vmem:[%s907_s16 + $0x18] sm:%s911_s17]  ;;  %s311_s16 = scalar_lea.vmem %s967_s5, %s615_s13 }
  0x17   : > { %733 = vmatpush3.bf16.msra.mxu1 %v702_v21  ;;  %707 = vmatprep.subr.bf16.mxu0 %v706_v30  ;;  %v382_v46 = vmul.f32 %v767_v42, %v895_v14  ;;  %v353_v50 = vadd.f32 %v349_v35, %v337_v34  ;;  %v398_v53 = vmul.f32 %v770_v44, %v628_v31 }
  0x18   : > { %v384_v36 = vadd.f32 %v380_v26, %v368_v29  ;;  %726 = vmatprep.subr.bf16.mxu1 %v706_v30  ;;  %v370_v52 = vadd.f32 %v366_v45, %v354_v38  ;;  %v355_v54 = vadd.f32 %v351_v40, %v339_v39  ;;  %v367_v55 = vmul.f32 %v767_v42, %v624_v13 }
  0x19   : > { %v369_v60 = vadd.f32 %v365_v51, %v353_v50  ;;  %v381_v61 = vmul.f32 %v764_v37, %v895_v14  ;;  %v383_v62 = vmul.f32 %v770_v44, %v895_v14  ;;  %v397_v4 = vmul.f32 %v767_v42, %v628_v31 }
  0x1a   : > { %v400_v49 = vadd.f32 %v396_v41, %v384_v36  ;;  %709 = vmatpush3.bf16.msra.mxu0 %v706_v30  ;;  %v386_v57 = vadd.f32 %v382_v46, %v370_v52  ;;  %v371_v0 = vadd.f32 %v367_v55, %v355_v54  ;;  %v399_v6 = vmul.f32 %v773_v1, %v628_v31 }
  0x1b   : > { %734 = vmatpush3.bf16.msra.mxu1 %v706_v30  ;;  %711 = vmatprep.subr.bf16.mxu0 %v710_v43  ;;  %v385_v3 = vadd.f32 %v381_v61, %v369_v60 }
  0x1c   : > { %727 = vmatprep.subr.bf16.mxu1 %v710_v43  ;;  %684 = vmatprep.mubr.f32.mxu0 %v400_v49  ;;  %v402_v63 = vadd.f32 %v398_v53, %v386_v57  ;;  %v387_v5 = vadd.f32 %v383_v62, %v371_v0 }
  0x1d   : > { %v401_v7 = vadd.f32 %v397_v4, %v385_v3 }
  0x1e   : > { %713 = vmatpush3.bf16.msra.mxu0 %v710_v43  ;;  %687 = vmatprep.mubr.f32.mxu1 %v402_v63  ;;  %v403_v8 = vadd.f32 %v399_v6, %v387_v5 }
  0x1f   : > { %735 = vmatpush3.bf16.msra.mxu1 %v710_v43  ;;  %715 = vmatprep.subr.bf16.mxu0 %v714_v56 }
  0x20   : > { %728 = vmatprep.subr.bf16.mxu1 %v714_v56 }
  0x22   : > { %717 = vmatpush3.bf16.msra.mxu0 %v714_v56 }
  0x23   : > { %736 = vmatpush3.bf16.msra.mxu1 %v714_v56  ;;  %719 = vmatprep.subr.bf16.mxu0 %v718_v2 }
  0x24   : > { %729 = vmatprep.subr.bf16.mxu1 %v718_v2 }
  0x26   : > { %721 = vmatpush3.bf16.msra.mxu0 %v718_v2 }
  0x27   : > { %737 = vmatpush3.bf16.msra.mxu1 %v718_v2 }
  0x29   : > { %685 = vmatmul.mubr.f32.vlgmr.msra.gmra.mrb[0].mxu0 %v401_v7 }
  0x2a   : > { %688 = vmatmul.mubr.f32.vlgmr.msra.gmra.mrb[0].mxu1 %v403_v8 }
  0xfc   : > { %v686_v10 = vpop.f32.mrb[0].mxu0 }
  0xfd   : > { %v689_v11 = vpop.f32.mrb[0].mxu1  ;;  %v493_v12 = vpop.f32.mrb[1].mxu0  ;;  %v499_v16 = vadd.f32 %v686_v10, %v629_v9 }
  0xfe   : > { %v503_v13 = vpop.f32.mrb[1].mxu1  ;;  %v494_v14 = vadd.f32 %v629_v9, %v493_v12  ;;  %v509_v17 = vadd.f32 %v689_v11, %v629_v9 }
  0xff   : > { %v504_v15 = vadd.f32 %v629_v9, %v503_v13  ;;  %513 = vst [vmem:[%s311_s16 + $0x8] sm:$0xff] %v499_v16 }
 0x100   : > { %512 = vst [vmem:[%s311_s16] sm:$0xff] %v494_v14  ;;  %515 = vst [vmem:[%s311_s16 + $0x18] sm:$0xff] %v509_v17 }
 0x101   : > { %514 = vst [vmem:[%s311_s16 + $0x10] sm:$0xff] %v504_v15 }
 0x102 PF: > { %s15_s20 = sadd.s32 1, %s796_s20   ;;  %s968_s18 = smov %s792_s19 }
 0x103   : > { %p12_p8 = scmp.ge.s32.totalorder %s15_s20, 4   ;;  %s969_s19 = smov %s971_s21 }
 0x105   :  { %14 = sbr.rel (!%p12_p8) target bundleno = 2 (0x2), region = 77 }

// kernel: lstm_row_conv_forward.3
= control target key start
LH: loop header
LB: loop body
LE: loop exit
PB: predicated region body
PF: predicated region fallthrough
CT: control target
= control target key end

     0   :  { %s2001_s18 = smov 0   ;;  %s2003_s19 = smov 0   ;;  %s2696_s0 = inlined_call_operand.vmem [shape: s32[8,1], index: 0, kind: input, shape index: {}]   ;;  %s2697_s1 = inlined_call_operand.vmem [shape: f32[8,8,128], index: 1, kind: input, shape index: {}]   ;;  %s2698_s2 = inlined_call_operand.vmem [shape: f32[128,512], index: 2, kind: input, shape index: {}]   ;;  %s2699_s3 = inlined_call_operand.vmem [shape: f32[128,512], index: 3, kind: input, shape index: {}]   ;;  %s2700_s4 = inlined_call_operand.vmem [shape: f32[1,512], index: 4, kind: input, shape index: {}]   ;;  %s2701_s5 = inlined_call_operand.vmem [shape: f32[8,8,128], index: 5, kind: output, shape index: {}]  }
   0x1   :  { %s2005_s20 = smov 0  }
   0x2 LB: > { %s24_s21 = sadd.s32 1, %s1962_s19  ;;  %p1475_p0 = scmp.ge.s32.totalorder %s1966_s20, 1  ;;  %s1966_s20 = sphi %s2005_s20, %s15_s20   ;;  %s1962_s19 = sphi %s2003_s19, %s2703_s19   ;;  %s1958_s18 = sphi %s2001_s18, %s2702_s18  }
   0x3   : > { %p25_p1 = scmp.ge.s32.totalorder %s24_s21, 2  ;;  %p216_p2 = scmp.lt.s32.totalorder %s1966_s20, 3 }
   0x5   : > { %s2705_s21 = smov (%p25_p1, %s24_s21), 0  ;;  %p217_p3 = pnand %p1475_p0, %p216_p2 }
   0x6   : > { %s2019_s22 = sshll.u32 (!%p217_p3), %s1958_s18, 2  ;;  %p1480_p5 = scmp.ne.s32.totalorder (!%p217_p3), %s1958_s18, 0 }
   0x7   : > { %220 = sbr.rel (%p217_p3) target bundleno = 1124 (0x464), region = 40  ;;  %p259_p4 = scmp.lt.s32.totalorder (!%p217_p3), %s2019_s22, 7 }
   0xe   : > { %s260_s23 = scalar_select %p259_p4, %s2019_s22, 7 }
   0xf   : > { %279 = sbr.rel (%p1480_p5) target bundleno = 22 (0x16), region = 44  ;;  %v1968_v0 = vmov (!%p1480_p5), 0.0  }
  0x10   : > { %s1477_s24 = sshll.u32 %s260_s23, 3  ;;  %280 = vst [vmem:[#allocation3] sm:$0xff] (!%p1480_p5), %v1968_v0  ;;  %281 = vst [vmem:[#allocation4] sm:$0xff] (!%p1480_p5), %v1968_v0 }
  0x11   : > { %s2026_s27 = scalar_lea.vmem %s2697_s1, %s1477_s24  ;;  %s2031_s30 = scalar_lea.vmem %s2701_s5, %s1477_s24 }
  0x16 PF: > { %v287_v1 = vld [vmem:[%s2698_s2 + $0x8] sm:$0xff]  ;;  %v289_v3 = vld [vmem:[%s2698_s2 + $0x18] sm:$0xff]  ;;  %v286_v6 = vld [vmem:[%s2698_s2] sm:$0xff]  ;;  %v1969_v8 = vmov 0.0   ;;  %v1970_v14 = vmov 0   ;;  %s992_s14 = sadd.s32 1, %s2019_s22 }
  0x17   : > { %v291_v2 = vld [vmem:[%s2698_s2 + $0x28] sm:$0xff]  ;;  %v293_v5 = vld [vmem:[%s2698_s2 + $0x38] sm:$0xff]  ;;  %v290_v7 = vld [vmem:[%s2698_s2 + $0x20] sm:$0xff]  ;;  %436 = vmatprep.mubr.f32.mxu0 %v1969_v8  ;;  %525 = vmatprep.mubr.f32.mxu1 %v1969_v8  ;;  %s1178_s17 = sadd.s32 2, %s2019_s22  ;;  %s1364_s18 = sadd.s32 3, %s2019_s22 }
  0x18   : > { %v1499_v4 = vpack.c.bf16 %v291_v2, %v287_v1  ;;  %v1531_v9 = vpack.c.bf16 %v293_v5, %v289_v3  ;;  %v1501_v10 = vpack.c.bf16 %v290_v7, %v286_v6  ;;  %v288_v11 = vld [vmem:[%s2698_s2 + $0x10] sm:$0xff]  ;;  %v295_v13 = vld [vmem:[%s2698_s2 + $0x48] sm:$0xff]  ;;  %1878 = vset.pattern.permute.xlu0 %v1970_v14  ;;  %1879 = vset.pattern.permute.xlu1 %v1970_v14  ;;  %v297_v17 = vld [vmem:[%s2698_s2 + $0x58] sm:$0xff] }
  0x19   : > { %v292_v12 = vld [vmem:[%s2698_s2 + $0x30] sm:$0xff]  ;;  %v299_v16 = vld [vmem:[%s2698_s2 + $0x68] sm:$0xff]  ;;  %v301_v18 = vld [vmem:[%s2698_s2 + $0x78] sm:$0xff] }
  0x1a   : > { %1500 = vmatprep.subr.bf16.mxu0 %v1499_v4  ;;  %v1533_v15 = vpack.c.bf16 %v292_v12, %v288_v11  ;;  %1532 = vmatprep.subr.bf16.mxu1 %v1531_v9  ;;  %v1503_v19 = vpack.c.bf16 %v299_v16, %v295_v13  ;;  %v1535_v20 = vpack.c.bf16 %v301_v18, %v297_v17  ;;  %v294_v21 = vld [vmem:[%s2698_s2 + $0x40] sm:$0xff]  ;;  %v296_v23 = vld [vmem:[%s2698_s2 + $0x50] sm:$0xff]  ;;  %v303_v26 = vld [vmem:[%s2698_s2 + $0x88] sm:$0xff] }
  0x1b   : > { %1502 = vmatpush1.bf16.msra.mxu0 %v1501_v10  ;;  %v298_v22 = vld [vmem:[%s2698_s2 + $0x60] sm:$0xff]  ;;  %v300_v25 = vld [vmem:[%s2698_s2 + $0x70] sm:$0xff]  ;;  %v307_v27 = vld [vmem:[%s2698_s2 + $0xa8] sm:$0xff] }
  0x1c   : > { %1534 = vmatpush1.bf16.msra.mxu1 %v1533_v15  ;;  %v1505_v24 = vpack.c.bf16 %v298_v22, %v294_v21  ;;  %1504 = vmatprep.subr.bf16.mxu0 %v1503_v19  ;;  %v1537_v28 = vpack.c.bf16 %v300_v25, %v296_v23  ;;  %v1507_v29 = vpack.c.bf16 %v307_v27, %v303_v26  ;;  %v305_v30 = vld [vmem:[%s2698_s2 + $0x98] sm:$0xff]  ;;  %v302_v32 = vld [vmem:[%s2698_s2 + $0x80] sm:$0xff]  ;;  %v304_v35 = vld [vmem:[%s2698_s2 + $0x90] sm:$0xff] }
  0x1d   : > { %1536 = vmatprep.subr.bf16.mxu1 %v1535_v20  ;;  %v309_v31 = vld [vmem:[%s2698_s2 + $0xb8] sm:$0xff]  ;;  %v306_v34 = vld [vmem:[%s2698_s2 + $0xa0] sm:$0xff]  ;;  %v308_v36 = vld [vmem:[%s2698_s2 + $0xb0] sm:$0xff] }
  0x1e   : > { %v1539_v33 = vpack.c.bf16 %v309_v31, %v305_v30  ;;  %v1509_v37 = vpack.c.bf16 %v306_v34, %v302_v32  ;;  %v311_v38 = vld [vmem:[%s2698_s2 + $0xc8] sm:$0xff]  ;;  %v313_v40 = vld [vmem:[%s2698_s2 + $0xd8] sm:$0xff]  ;;  %v1541_v41 = vpack.c.bf16 %v308_v36, %v304_v35  ;;  %v310_v44 = vld [vmem:[%s2698_s2 + $0xc0] sm:$0xff] }
  0x1f   : > { %1506 = vmatpush1.bf16.msra.mxu0 %v1505_v24  ;;  %v315_v39 = vld [vmem:[%s2698_s2 + $0xe8] sm:$0xff]  ;;  %v317_v43 = vld [vmem:[%s2698_s2 + $0xf8] sm:$0xff]  ;;  %v314_v45 = vld [vmem:[%s2698_s2 + $0xe0] sm:$0xff] }
  0x20   : > { %1538 = vmatpush1.bf16.msra.mxu1 %v1537_v28  ;;  %1508 = vmatprep.subr.bf16.mxu0 %v1507_v29  ;;  %v1511_v42 = vpack.c.bf16 %v315_v39, %v311_v38  ;;  %v1543_v46 = vpack.c.bf16 %v317_v43, %v313_v40  ;;  %v312_v47 = vld [vmem:[%s2698_s2 + $0xd0] sm:$0xff]  ;;  %v319_v49 = vld [vmem:[%s2698_s2 + $0x108] sm:$0xff]  ;;  %v321_v51 = vld [vmem:[%s2698_s2 + $0x118] sm:$0xff]  ;;  %v1513_v53 = vpack.c.bf16 %v314_v45, %v310_v44 }
  0x21   : > { %1540 = vmatprep.subr.bf16.mxu1 %v1539_v33  ;;  %v316_v48 = vld [vmem:[%s2698_s2 + $0xf0] sm:$0xff]  ;;  %v323_v50 = vld [vmem:[%s2698_s2 + $0x128] sm:$0xff]  ;;  %v325_v52 = vld [vmem:[%s2698_s2 + $0x138] sm:$0xff] }
  0x22   : > { %v1545_v54 = vpack.c.bf16 %v316_v48, %v312_v47  ;;  %v1515_v55 = vpack.c.bf16 %v323_v50, %v319_v49  ;;  %v318_v56 = vld [vmem:[%s2698_s2 + $0x100] sm:$0xff]  ;;  %v320_v58 = vld [vmem:[%s2698_s2 + $0x110] sm:$0xff]  ;;  %v1547_v59 = vpack.c.bf16 %v325_v52, %v321_v51  ;;  %v327_v61 = vld [vmem:[%s2698_s2 + $0x148] sm:$0xff] }
  0x23   : > { %1510 = vmatpush1.bf16.msra.mxu0 %v1509_v37  ;;  %v322_v57 = vld [vmem:[%s2698_s2 + $0x120] sm:$0xff]  ;;  %v324_v60 = vld [vmem:[%s2698_s2 + $0x130] sm:$0xff]  ;;  %v331_v62 = vld [vmem:[%s2698_s2 + $0x168] sm:$0xff] }
  0x24   : > { %1542 = vmatpush1.bf16.msra.mxu1 %v1541_v41  ;;  %1512 = vmatprep.subr.bf16.mxu0 %v1511_v42  ;;  %v329_v63 = vld [vmem:[%s2698_s2 + $0x158] sm:$0xff]  ;;  %v1517_v1 = vpack.c.bf16 %v322_v57, %v318_v56  ;;  %v1549_v2 = vpack.c.bf16 %v324_v60, %v320_v58  ;;  %v1519_v3 = vpack.c.bf16 %v331_v62, %v327_v61  ;;  %v326_v4 = vld [vmem:[%s2698_s2 + $0x140] sm:$0xff]  ;;  %v328_v6 = vld [vmem:[%s2698_s2 + $0x150] sm:$0xff] }
  0x25   : > { %1544 = vmatprep.subr.bf16.mxu1 %v1543_v46  ;;  %v333_v0 = vld [vmem:[%s2698_s2 + $0x178] sm:$0xff]  ;;  %v330_v5 = vld [vmem:[%s2698_s2 + $0x160] sm:$0xff]  ;;  %v332_v9 = vld [vmem:[%s2698_s2 + $0x170] sm:$0xff] }
  0x26   : > { %v1551_v7 = vpack.c.bf16 %v333_v0, %v329_v63  ;;  %v335_v10 = vld [vmem:[%s2698_s2 + $0x188] sm:$0xff]  ;;  %v337_v12 = vld [vmem:[%s2698_s2 + $0x198] sm:$0xff]  ;;  %v1521_v15 = vpack.c.bf16 %v330_v5, %v326_v4  ;;  %v1553_v16 = vpack.c.bf16 %v332_v9, %v328_v6  ;;  %v334_v18 = vld [vmem:[%s2698_s2 + $0x180] sm:$0xff] }
  0x27   : > { %1514 = vmatpush1.bf16.msra.mxu0 %v1513_v53  ;;  %v339_v11 = vld [vmem:[%s2698_s2 + $0x1a8] sm:$0xff]  ;;  %v341_v13 = vld [vmem:[%s2698_s2 + $0x1b8] sm:$0xff]  ;;  %v338_v19 = vld [vmem:[%s2698_s2 + $0x1a0] sm:$0xff] }
  0x28   : > { %1546 = vmatpush1.bf16.msra.mxu1 %v1545_v54  ;;  %1516 = vmatprep.subr.bf16.mxu0 %v1515_v55  ;;  %v1523_v17 = vpack.c.bf16 %v339_v11, %v335_v10  ;;  %v336_v20 = vld [vmem:[%s2698_s2 + $0x190] sm:$0xff]  ;;  %v1555_v21 = vpack.c.bf16 %v341_v13, %v337_v12  ;;  %v343_v23 = vld [vmem:[%s2698_s2 + $0x1c8] sm:$0xff]  ;;  %v345_v25 = vld [vmem:[%s2698_s2 + $0x1d8] sm:$0xff]  ;;  %v1525_v27 = vpack.c.bf16 %v338_v19, %v334_v18 }
  0x29   : > { %1548 = vmatprep.subr.bf16.mxu1 %v1547_v59  ;;  %v340_v22 = vld [vmem:[%s2698_s2 + $0x1b0] sm:$0xff]  ;;  %v347_v24 = vld [vmem:[%s2698_s2 + $0x1e8] sm:$0xff]  ;;  %v349_v26 = vld [vmem:[%s2698_s2 + $0x1f8] sm:$0xff] }
  0x2a   : > { %v1557_v28 = vpack.c.bf16 %v340_v22, %v336_v20  ;;  %v1527_v29 = vpack.c.bf16 %v347_v24, %v343_v23  ;;  %v342_v30 = vld [vmem:[%s2698_s2 + $0x1c0] sm:$0xff]  ;;  %v344_v32 = vld [vmem:[%s2698_s2 + $0x1d0] sm:$0xff]  ;;  %v1559_v33 = vpack.c.bf16 %v349_v26, %v345_v25  ;;  %v567_v35 = vld [vmem:[%s2699_s3 + $0x8] sm:$0xff]  ;;  %v808_v26 = vstv %s2019_s22 }
  0x2b   : > { %1518 = vmatpush1.bf16.msra.mxu0 %v1517_v1  ;;  %v346_v31 = vld [vmem:[%s2698_s2 + $0x1e0] sm:$0xff]  ;;  %v348_v34 = vld [vmem:[%s2698_s2 + $0x1f0] sm:$0xff]  ;;  %v571_v36 = vld [vmem:[%s2699_s3 + $0x28] sm:$0xff] }
  0x2c   : > { %1550 = vmatpush1.bf16.msra.mxu1 %v1549_v2  ;;  %1520 = vmatprep.subr.bf16.mxu0 %v1519_v3  ;;  %v569_v37 = vld [vmem:[%s2699_s3 + $0x18] sm:$0xff]  ;;  %v1529_v39 = vpack.c.bf16 %v346_v31, %v342_v30  ;;  %v1561_v40 = vpack.c.bf16 %v348_v34, %v344_v32  ;;  %v2241_v41 = vpack.c.bf16 %v571_v36, %v567_v35  ;;  %v566_v42 = vld [vmem:[%s2699_s3] sm:$0xff]  ;;  %v568_v44 = vld [vmem:[%s2699_s3 + $0x10] sm:$0xff] }
  0x2d   : > { %1552 = vmatprep.subr.bf16.mxu1 %v1551_v7  ;;  %v573_v38 = vld [vmem:[%s2699_s3 + $0x38] sm:$0xff]  ;;  %v570_v43 = vld [vmem:[%s2699_s3 + $0x20] sm:$0xff]  ;;  %v572_v46 = vld [vmem:[%s2699_s3 + $0x30] sm:$0xff] }
  0x2e   : > { %v2252_v45 = vpack.c.bf16 %v573_v38, %v569_v37  ;;  %v575_v47 = vld [vmem:[%s2699_s3 + $0x48] sm:$0xff]  ;;  %v577_v49 = vld [vmem:[%s2699_s3 + $0x58] sm:$0xff]  ;;  %v282_v51 = vld [vmem:[%s2026_s27] sm:$0xff]  ;;  %v2270_v52 = vpack.c.bf16 %v570_v43, %v566_v42  ;;  %v2273_v53 = vpack.c.bf16 %v572_v46, %v568_v44 }
  0x2f   : > { %1522 = vmatpush1.bf16.msra.mxu0 %v1521_v15  ;;  %v579_v48 = vld [vmem:[%s2699_s3 + $0x68] sm:$0xff]  ;;  %v581_v50 = vld [vmem:[%s2699_s3 + $0x78] sm:$0xff]  ;;  %v574_v55 = vld [vmem:[%s2699_s3 + $0x40] sm:$0xff] }
  0x30   : > { %1554 = vmatpush1.bf16.msra.mxu1 %v1553_v16  ;;  %1524 = vmatprep.subr.bf16.mxu0 %v1523_v17  ;;  %v2275_v54 = vpack.c.bf16 %v579_v48, %v575_v47  ;;  %v578_v56 = vld [vmem:[%s2699_s3 + $0x60] sm:$0xff]  ;;  %v576_v57 = vld [vmem:[%s2699_s3 + $0x50] sm:$0xff]  ;;  %v2287_v58 = vpack.c.bf16 %v581_v50, %v577_v49  ;;  %v583_v60 = vld [vmem:[%s2699_s3 + $0x88] sm:$0xff] }
  0x31   : > { %1556 = vmatprep.subr.bf16.mxu1 %v1555_v21  ;;  %v580_v59 = vld [vmem:[%s2699_s3 + $0x70] sm:$0xff]  ;;  %v587_v61 = vld [vmem:[%s2699_s3 + $0xa8] sm:$0xff]  ;;  %v585_v62 = vld [vmem:[%s2699_s3 + $0x98] sm:$0xff]  ;;  %v2305_v0 = vpack.c.bf16 %v578_v56, %v574_v55 }
  0x32   : > { %v589_v63 = vld [vmem:[%s2699_s3 + $0xb8] sm:$0xff]  ;;  %v283_v1 = vld [vmem:[%s2026_s27 + $0x8] sm:$0xff]  ;;  %v2310_v2 = vpack.c.bf16 %v580_v59, %v576_v57  ;;  %v2312_v3 = vpack.c.bf16 %v587_v61, %v583_v60  ;;  %v582_v4 = vld [vmem:[%s2699_s3 + $0x80] sm:$0xff] }
  0x33   : > { %1526 = vmatpush1.bf16.msra.mxu0 %v1525_v27  ;;  %v586_v5 = vld [vmem:[%s2699_s3 + $0xa0] sm:$0xff]  ;;  %v584_v6 = vld [vmem:[%s2699_s3 + $0x90] sm:$0xff]  ;;  %v2324_v7 = vpack.c.bf16 %v589_v63, %v585_v62  ;;  %v591_v10 = vld [vmem:[%s2699_s3 + $0xc8] sm:$0xff] }
  0x34   : > { %1558 = vmatpush1.bf16.msra.mxu1 %v1557_v28  ;;  %1528 = vmatprep.subr.bf16.mxu0 %v1527_v29  ;;  %v588_v9 = vld [vmem:[%s2699_s3 + $0xb0] sm:$0xff]  ;;  %v595_v11 = vld [vmem:[%s2699_s3 + $0xe8] sm:$0xff]  ;;  %v593_v12 = vld [vmem:[%s2699_s3 + $0xd8] sm:$0xff]  ;;  %v2344_v15 = vpack.c.bf16 %v586_v5, %v582_v4 }
  0x35   : > { %1560 = vmatprep.subr.bf16.mxu1 %v1559_v33  ;;  %v597_v13 = vld [vmem:[%s2699_s3 + $0xf8] sm:$0xff]  ;;  %v284_v16 = vld [vmem:[%s2026_s27 + $0x10] sm:$0xff]  ;;  %v2349_v17 = vpack.c.bf16 %v588_v9, %v584_v6  ;;  %v2351_v18 = vpack.c.bf16 %v595_v11, %v591_v10  ;;  %v590_v19 = vld [vmem:[%s2699_s3 + $0xc0] sm:$0xff] }
  0x36   : > { %v594_v20 = vld [vmem:[%s2699_s3 + $0xe0] sm:$0xff]  ;;  %v592_v21 = vld [vmem:[%s2699_s3 + $0xd0] sm:$0xff]  ;;  %v2363_v22 = vpack.c.bf16 %v597_v13, %v593_v12  ;;  %v599_v24 = vld [vmem:[%s2699_s3 + $0x108] sm:$0xff] }
  0x37   : > { %1530 = vmatpush1.bf16.msra.mxu0 %v1529_v39  ;;  %v596_v23 = vld [vmem:[%s2699_s3 + $0xf0] sm:$0xff]  ;;  %v603_v25 = vld [vmem:[%s2699_s3 + $0x128] sm:$0xff]  ;;  %v601_v27 = vld [vmem:[%s2699_s3 + $0x118] sm:$0xff]  ;;  %v2384_v29 = vpack.c.bf16 %v594_v20, %v590_v19 }
  0x38   : > { %1562 = vmatpush1.bf16.msra.mxu1 %v1561_v40  ;;  %1564 = vmatprep.subr.bf16.mxu0 %v2241_v41  ;;  %v605_v28 = vld [vmem:[%s2699_s3 + $0x138] sm:$0xff]  ;;  %v2390_v31 = vld [vmem:[%s2696_s0] sm:$0xff]  ;;  %v2394_v32 = vpack.c.bf16 %v596_v23, %v592_v21  ;;  %v2396_v33 = vpack.c.bf16 %v603_v25, %v599_v24  ;;  %v600_v36 = vld [vmem:[%s2699_s3 + $0x110] sm:$0xff] }
  0x39   : > { %1596 = vmatprep.subr.bf16.mxu1 %v2252_v45  ;;  %v285_v30 = vld [vmem:[%s2026_s27 + $0x18] sm:$0xff]  ;;  %v598_v34 = vld [vmem:[%s2699_s3 + $0x100] sm:$0xff]  ;;  %vm809_vm0 = vcmp.gt.s32.totalorder %v2390_v31, %v808_v26  ;;  %v2409_v37 = vpack.c.bf16 %v605_v28, %v601_v27  ;;  %v604_v38 = vld [vmem:[%s2699_s3 + $0x130] sm:$0xff] }
  0x3a   : > { %437 = vmatmul.mubr.f32.vlgmr.msra.gmra.mrb[0].mxu0 %v282_v51  ;;  %v602_v35 = vld [vmem:[%s2699_s3 + $0x120] sm:$0xff]  ;;  %v607_v39 = vld [vmem:[%s2699_s3 + $0x148] sm:$0xff]  ;;  %v609_v42 = vld [vmem:[%s2699_s3 + $0x158] sm:$0xff]  ;;  %v810_v46 = vsel %vm809_vm0, 1, %v1970_v14  ;;  %v2434_v47 = vpack.c.bf16 %v604_v38, %v600_v36  ;;  %v352_v38 = vlaneseq }
  0x3b   : > { %526 = vmatmul.mubr.f32.vlgmr.msra.gmra.mrb[0].mxu1 %v282_v51  ;;  %1566 = vmatpush1.bf16.msra.mxu0 %v2270_v52  ;;  %v611_v40 = vld [vmem:[%s2699_s3 + $0x168] sm:$0xff]  ;;  %v613_v43 = vld [vmem:[%s2699_s3 + $0x178] sm:$0xff]  ;;  %v2429_v44 = vpack.c.bf16 %v602_v35, %v598_v34  ;;  %v606_v49 = vld [vmem:[%s2699_s3 + $0x140] sm:$0xff]  ;;  %v993_v35 = vstv %s992_s14 }
  0x3c   : > { %1598 = vmatpush1.bf16.msra.mxu1 %v2273_v53  ;;  %1568 = vmatprep.subr.bf16.mxu0 %v2275_v54  ;;  %v2436_v48 = vpack.c.bf16 %v611_v40, %v607_v39  ;;  %v610_v50 = vld [vmem:[%s2699_s3 + $0x160] sm:$0xff]  ;;  %v608_v51 = vld [vmem:[%s2699_s3 + $0x150] sm:$0xff]  ;;  %v2448_v55 = vpack.c.bf16 %v613_v43, %v609_v42  ;;  %v615_v57 = vld [vmem:[%s2699_s3 + $0x188] sm:$0xff]  ;;  %vm994_vm1 = vcmp.gt.s32.totalorder %v2390_v31, %v993_v35  ;;  %v353_v39 = vshrl.u32 %v352_v38, 7 }
  0x3d   : > { %1600 = vmatprep.subr.bf16.mxu1 %v2287_v58  ;;  %442 = vmatprep.mubr.f32.mxu0 %v1969_v8  ;;  %v612_v56 = vld [vmem:[%s2699_s3 + $0x170] sm:$0xff]  ;;  %v619_v59 = vld [vmem:[%s2699_s3 + $0x1a8] sm:$0xff]  ;;  %v617_v60 = vld [vmem:[%s2699_s3 + $0x198] sm:$0xff]  ;;  %v2468_v62 = vpack.c.bf16 %v610_v50, %v606_v49  ;;  %v995_v36 = vsel %vm994_vm1, 1, %v1970_v14 }
  0x3e   : > { %531 = vmatprep.mubr.f32.mxu1 %v1969_v8  ;;  %443 = vmatmul.mubr.f32.gmra.mrb[2].mxu0 %v283_v1  ;;  %v621_v61 = vld [vmem:[%s2699_s3 + $0x1b8] sm:$0xff]  ;;  %v2472_v63 = vpack.c.bf16 %v612_v56, %v608_v51  ;;  %v614_v4 = vld [vmem:[%s2699_s3 + $0x180] sm:$0xff]  ;;  %v616_v6 = vld [vmem:[%s2699_s3 + $0x190] sm:$0xff]  ;;  %v354_v40 = vsub.s32 0, %v353_v39  ;;  %v358_v43 = vsub.s32 1, %v353_v39  ;;  %v366_v51 = vsub.s32 3, %v353_v39 }
  0x3f   : > { %1570 = vmatpush1.bf16.msra.mxu0 %v2305_v0  ;;  %532 = vmatmul.mubr.f32.gmra.mrb[2].mxu1 %v283_v1  ;;  %v2474_v1 = vpack.c.bf16 %v619_v59, %v615_v57  ;;  %v618_v5 = vld [vmem:[%s2699_s3 + $0x1a0] sm:$0xff]  ;;  %v2486_v9 = vpack.c.bf16 %v621_v61, %v617_v60  ;;  %v620_v10 = vld [vmem:[%s2699_s3 + $0x1b0] sm:$0xff]  ;;  %v623_v11 = vld [vmem:[%s2699_s3 + $0x1c8] sm:$0xff] }
  0x40   : > { %1602 = vmatpush1.bf16.msra.mxu1 %v2310_v2  ;;  %1572 = vmatprep.subr.bf16.mxu0 %v2312_v3  ;;  %v627_v12 = vld [vmem:[%s2699_s3 + $0x1e8] sm:$0xff]  ;;  %v625_v13 = vld [vmem:[%s2699_s3 + $0x1d8] sm:$0xff]  ;;  %v2504_v19 = vpack.c.bf16 %v618_v5, %v614_v4  ;;  %v2508_v20 = vpack.c.bf16 %v620_v10, %v616_v6  ;;  %v622_v23 = vld [vmem:[%s2699_s3 + $0x1c0] sm:$0xff]  ;;  %v362_v10 = vsub.s32 2, %v353_v39 }
  0x41   : > { %1604 = vmatprep.subr.bf16.mxu1 %v2324_v7  ;;  %448 = vmatprep.mubr.f32.mxu0 %v1969_v8  ;;  %v2510_v21 = vpack.c.bf16 %v627_v12, %v623_v11  ;;  %v626_v24 = vld [vmem:[%s2699_s3 + $0x1e0] sm:$0xff]  ;;  %v624_v26 = vld [vmem:[%s2699_s3 + $0x1d0] sm:$0xff] }
  0x42   : > { %537 = vmatprep.mubr.f32.mxu1 %v1969_v8  ;;  %449 = vmatmul.mubr.f32.gmra.mrb[4].mxu0 %v284_v16  ;;  %v628_v27 = vld [vmem:[%s2699_s3 + $0x1f0] sm:$0xff]  ;;  %v2528_v28 = vpack.c.bf16 %v626_v24, %v622_v23  ;;  %v632_v34 = vld [vmem:[#allocation3] sm:$0xff] }
  0x43   : > { %1574 = vmatpush1.bf16.msra.mxu0 %v2344_v15  ;;  %538 = vmatmul.mubr.f32.gmra.mrb[4].mxu1 %v284_v16  ;;  %v629_v16 = vld [vmem:[%s2699_s3 + $0x1f8] sm:$0xff]  ;;  %v350_v42 = vld [vmem:[%s2700_s4] sm:$0xf] }
  0x44   : > { %1606 = vmatpush1.bf16.msra.mxu1 %v2349_v17  ;;  %1576 = vmatprep.subr.bf16.mxu0 %v2351_v18  ;;  %v2519_v25 = vpack.c.bf16 %v629_v16, %v625_v13  ;;  %v2581_v49 = vrot.slane %v350_v42, %v358_v43  ;;  %v2585_v6 = vrot.slane %v350_v42, %v366_v51 }
  0x45   : > { %1608 = vmatprep.subr.bf16.mxu1 %v2363_v22  ;;  %454 = vmatprep.mubr.f32.mxu0 %v1969_v8  ;;  %v2588_v12 = vrot.slane %v350_v42, %v362_v10 }
  0x46   : > { %543 = vmatprep.mubr.f32.mxu1 %v1969_v8  ;;  %455 = vmatmul.mubr.f32.gmra.mrb[6].mxu0 %v285_v30 }
  0x47   : > { %1578 = vmatpush1.bf16.msra.mxu0 %v2384_v29  ;;  %544 = vmatmul.mubr.f32.gmra.mrb[6].mxu1 %v285_v30  ;;  %v2532_v30 = vpack.c.bf16 %v628_v27, %v624_v26 }
  0x48   : > { %1610 = vmatpush1.bf16.msra.mxu1 %v2394_v32  ;;  %1580 = vmatprep.subr.bf16.mxu0 %v2396_v33 }
  0x49   : > { %1612 = vmatprep.subr.bf16.mxu1 %v2409_v37  ;;  %702 = vmatprep.mubr.f32.mxu0 %v1969_v8 }
  0x4a   : > { %773 = vmatprep.mubr.f32.mxu1 %v1969_v8  ;;  %812 = vperm.xlu0 %1878, %v810_v46   ;;  %v2579_v46 = vrot.slane %v350_v42, %v354_v40 }
  0x4b   : > { %1582 = vmatpush1.bf16.msra.mxu0 %v2429_v44 }
  0x4c   : > { %1614 = vmatpush1.bf16.msra.mxu1 %v2434_v47  ;;  %1584 = vmatprep.subr.bf16.mxu0 %v2436_v48 }
  0x4d   : > { %1616 = vmatprep.subr.bf16.mxu1 %v2448_v55 }
  0x4e   : > { %997 = vperm.xlu0 %1878, %v995_v36   ;;  %v633_v36 = vld [vmem:[#allocation4] sm:$0xff] }
  0x4f   : > { %1586 = vmatpush1.bf16.msra.mxu0 %v2468_v62 }
  0x50   : > { %1618 = vmatpush1.bf16.msra.mxu1 %v2472_v63  ;;  %1588 = vmatprep.subr.bf16.mxu0 %v2474_v1 }
  0x51   : > { %1620 = vmatprep.subr.bf16.mxu1 %v2486_v9 }
  0x53   : > { %1590 = vmatpush1.bf16.msra.mxu0 %v2504_v19 }
  0x54   : > { %1622 = vmatpush1.bf16.msra.mxu1 %v2508_v20  ;;  %1592 = vmatprep.subr.bf16.mxu0 %v2510_v21 }
  0x55   : > { %1624 = vmatprep.subr.bf16.mxu1 %v2519_v25 }
  0x57   : > { %1594 = vmatpush1.bf16.msra.mxu0 %v2528_v28 }
  0x58   : > { %1626 = vmatpush1.bf16.msra.mxu1 %v2532_v30  ;;  %1628 = vmatprep.subr.bf16.mxu0 %v2241_v41 }
  0x59   : > { %1660 = vmatprep.subr.bf16.mxu1 %v2252_v45 }
  0x5a   : > { %703 = vmatmul.mubr.f32.vlgmr.msra.gmra.mrb[0].mxu0 %v632_v34 }
  0x5b   : > { %774 = vmatmul.mubr.f32.vlgmr.msra.gmra.mrb[0].mxu1 %v632_v34  ;;  %1630 = vmatpush1.bf16.msra.mxu0 %v2270_v52 }
  0x5c   : > { %1662 = vmatpush1.bf16.msra.mxu1 %v2273_v53  ;;  %1632 = vmatprep.subr.bf16.mxu0 %v2275_v54 }
  0x5d   : > { %1664 = vmatprep.subr.bf16.mxu1 %v2287_v58  ;;  %886 = vmatprep.mubr.f32.mxu0 %v1969_v8 }
  0x5e   : > { %957 = vmatprep.mubr.f32.mxu1 %v1969_v8 }
  0x5f   : > { %1634 = vmatpush1.bf16.msra.mxu0 %v2305_v0 }
  0x60   : > { %1666 = vmatpush1.bf16.msra.mxu1 %v2310_v2  ;;  %1636 = vmatprep.subr.bf16.mxu0 %v2312_v3 }
  0x61   : > { %1668 = vmatprep.subr.bf16.mxu1 %v2324_v7 }
  0x63   : > { %1638 = vmatpush1.bf16.msra.mxu0 %v2344_v15 }
  0x64   : > { %1670 = vmatpush1.bf16.msra.mxu1 %v2349_v17  ;;  %1640 = vmatprep.subr.bf16.mxu0 %v2351_v18 }
  0x65   : > { %1672 = vmatprep.subr.bf16.mxu1 %v2363_v22 }
  0x67   : > { %1642 = vmatpush1.bf16.msra.mxu0 %v2384_v29 }
  0x68   : > { %1674 = vmatpush1.bf16.msra.mxu1 %v2394_v32  ;;  %1644 = vmatprep.subr.bf16.mxu0 %v2396_v33 }
  0x69   : > { %1676 = vmatprep.subr.bf16.mxu1 %v2409_v37 }
  0x6b   : > { %1646 = vmatpush1.bf16.msra.mxu0 %v2429_v44 }
  0x6c   : > { %1678 = vmatpush1.bf16.msra.mxu1 %v2434_v47  ;;  %1648 = vmatprep.subr.bf16.mxu0 %v2436_v48 }
  0x6d   : > { %1680 = vmatprep.subr.bf16.mxu1 %v2448_v55 }
  0x6f   : > { %1650 = vmatpush1.bf16.msra.mxu0 %v2468_v62 }
  0x70   : > { %1682 = vmatpush1.bf16.msra.mxu1 %v2472_v63  ;;  %1652 = vmatprep.subr.bf16.mxu0 %v2474_v1 }
  0x71   : > { %1684 = vmatprep.subr.bf16.mxu1 %v2486_v9 }
  0x73   : > { %1654 = vmatpush1.bf16.msra.mxu0 %v2504_v19 }
  0x74   : > { %1686 = vmatpush1.bf16.msra.mxu1 %v2508_v20  ;;  %1656 = vmatprep.subr.bf16.mxu0 %v2510_v21 }
  0x75   : > { %1688 = vmatprep.subr.bf16.mxu1 %v2519_v25 }
  0x77   : > { %1658 = vmatpush1.bf16.msra.mxu0 %v2528_v28 }
  0x78   : > { %1690 = vmatpush1.bf16.msra.mxu1 %v2532_v30  ;;  %1692 = vmatprep.subr.bf16.mxu0 %v2241_v41 }
  0x79   : > { %1724 = vmatprep.subr.bf16.mxu1 %v2252_v45 }
  0xc9   : > { %v813_v51 = vpop.permute.xlu0 %812 }
  0xca   : > { %vm814_vm2 = vcmp.eq.s32.totalorder %v813_v51, 1 }
 0x12d   : > { %v704_v50 = vpop.f32.mrb[0].mxu0 }
 0x12e   : > { %v1819_v56 = vadd.f32 %v704_v50, %v2579_v46  ;;  %v775_v57 = vpop.f32.mrb[0].mxu1  ;;  %v706_v59 = vpop.f32.mrb[1].mxu0 }
 0x12f   : > { %v1820_v60 = vadd.f32 %v706_v59, %v2581_v49  ;;  %v777_v61 = vpop.f32.mrb[1].mxu1  ;;  %v1827_v16 = vadd.f32 %v775_v57, %v2588_v12 }
 0x130   : > { %v1482_v4 = vmul.f32 -1.442695, %v1819_v56  ;;  %v1828_v11 = vadd.f32 %v777_v61, %v2585_v6  ;;  %v1179_v61 = vstv %s1178_s17 }
 0x131   : > { %v1483_v5 = vmul.f32 -1.442695, %v1820_v60  ;;  %vm1180_vm3 = vcmp.gt.s32.totalorder %v2390_v31, %v1179_v61 }
 0x132   : > { %1880 = vpow2.f32 %v1482_v4  ;;  %v1484_v13 = vmul.f32 -1.442695, %v1828_v11  ;;  %v1181_v4 = vsel %vm1180_vm3, 1, %v1970_v14 }
 0x133   : > { %1882 = vpow2.f32 %v1483_v5  ;;  %1183 = vperm.xlu1 %1879, %v1181_v4  }
 0x134   : > { %1884 = vpow2.f32 %v1484_v13 }
 0x135   : > { %1886 = vtanh.f32 %v1827_v16 }
 0x13c   : > { %v1881_v23 = vpop.eup %1880 }
 0x13d   : > { %v1883_v24 = vpop.eup %1882  ;;  %v787_v26 = vadd.f32 1.0, %v1881_v23 }
 0x13e   : > { %v793_v27 = vadd.f32 1.0, %v1883_v24  ;;  %v1885_v34 = vpop.eup %1884 }
 0x13f   : > { %1888 = vrcp.f32 %v787_v26  ;;  %v1887_v35 = vpop.eup %1886  ;;  %v800_v42 = vadd.f32 1.0, %v1885_v34 }
 0x140   : > { %1890 = vrcp.f32 %v793_v27 }
 0x141   : > { %1892 = vrcp.f32 %v800_v42 }
 0x149   : > { %v1889_v38 = vpop.eup %1888 }
 0x14a   : > { %v1891_v39 = vpop.eup %1890  ;;  %v804_v40 = vmul.f32 %v1889_v38, %v1887_v35 }
 0x14b   : > { %v803_v43 = vmul.f32 %v1891_v39, %v633_v36  ;;  %v1893_v56 = vpop.eup %1892 }
 0x14d   : > { %v2591_v50 = vadd.f32 %v804_v40, %v803_v43 }
 0x14f   : > { %1894 = vtanh.f32 %v2591_v50 }
 0x159   : > { %v1895_v57 = vpop.eup %1894 }
 0x15a   : > { %v807_v59 = vmul.f32 %v1895_v57, %v1893_v56 }
 0x15c   : > { %v815_v60 = vsel %vm814_vm2, %v807_v59, 0.0  ;;  %887 = vmatmul.mubr.f32.vlgmr.msra.gmra.mrb[2].mxu0 %v807_v59  ;;  %958 = vmatmul.mubr.f32.vlgmr.msra.gmra.mrb[2].mxu1 %v807_v59 }
 0x15d   : > { %816 = vst [vmem:[%s2031_s30] sm:$0xff] %v815_v60  ;;  %1694 = vmatpush1.bf16.msra.mxu0 %v2270_v52  ;;  %1726 = vmatpush1.bf16.msra.mxu1 %v2273_v53  ;;  %v998_v60 = vpop.permute.xlu0 %997 }
 0x15e   : > { %1696 = vmatprep.subr.bf16.mxu0 %v2275_v54  ;;  %1728 = vmatprep.subr.bf16.mxu1 %v2287_v58  ;;  %vm999_vm4 = vcmp.eq.s32.totalorder %v998_v60, 1 }
 0x15f   : > { %1072 = vmatprep.mubr.f32.mxu0 %v1969_v8  ;;  %1143 = vmatprep.mubr.f32.mxu1 %v1969_v8 }
 0x161   : > { %1698 = vmatpush1.bf16.msra.mxu0 %v2305_v0  ;;  %1730 = vmatpush1.bf16.msra.mxu1 %v2310_v2 }
 0x162   : > { %1700 = vmatprep.subr.bf16.mxu0 %v2312_v3  ;;  %1732 = vmatprep.subr.bf16.mxu1 %v2324_v7 }
 0x165   : > { %1702 = vmatpush1.bf16.msra.mxu0 %v2344_v15  ;;  %1734 = vmatpush1.bf16.msra.mxu1 %v2349_v17 }
 0x166   : > { %1704 = vmatprep.subr.bf16.mxu0 %v2351_v18  ;;  %1736 = vmatprep.subr.bf16.mxu1 %v2363_v22 }
 0x169   : > { %1706 = vmatpush1.bf16.msra.mxu0 %v2384_v29  ;;  %1738 = vmatpush1.bf16.msra.mxu1 %v2394_v32 }
 0x16a   : > { %1708 = vmatprep.subr.bf16.mxu0 %v2396_v33  ;;  %1740 = vmatprep.subr.bf16.mxu1 %v2409_v37 }
 0x16d   : > { %1710 = vmatpush1.bf16.msra.mxu0 %v2429_v44  ;;  %1742 = vmatpush1.bf16.msra.mxu1 %v2434_v47 }
 0x16e   : > { %1712 = vmatprep.subr.bf16.mxu0 %v2436_v48  ;;  %1744 = vmatprep.subr.bf16.mxu1 %v2448_v55 }
 0x171   : > { %1714 = vmatpush1.bf16.msra.mxu0 %v2468_v62  ;;  %1746 = vmatpush1.bf16.msra.mxu1 %v2472_v63 }
 0x172   : > { %1716 = vmatprep.subr.bf16.mxu0 %v2474_v1  ;;  %1748 = vmatprep.subr.bf16.mxu1 %v2486_v9 }
 0x175   : > { %1718 = vmatpush1.bf16.msra.mxu0 %v2504_v19  ;;  %1750 = vmatpush1.bf16.msra.mxu1 %v2508_v20 }
 0x176   : > { %1720 = vmatprep.subr.bf16.mxu0 %v2510_v21  ;;  %1752 = vmatprep.subr.bf16.mxu1 %v2519_v25 }
 0x179   : > { %1722 = vmatpush1.bf16.msra.mxu0 %v2528_v28  ;;  %1754 = vmatpush1.bf16.msra.mxu1 %v2532_v30 }
 0x17a   : > { %1756 = vmatprep.subr.bf16.mxu0 %v2241_v41  ;;  %1788 = vmatprep.subr.bf16.mxu1 %v2252_v45 }
 0x22f   : > { %v888_v5 = vpop.f32.mrb[2].mxu0  ;;  %v959_v10 = vpop.f32.mrb[2].mxu1 }
 0x230   : > { %v1821_v11 = vadd.f32 %v888_v5, %v2579_v46  ;;  %v890_v13 = vpop.f32.mrb[3].mxu0  ;;  %v961_v16 = vpop.f32.mrb[3].mxu1  ;;  %v1829_v27 = vadd.f32 %v959_v10, %v2588_v12 }
 0x231   : > { %v1822_v23 = vadd.f32 %v890_v13, %v2581_v49  ;;  %v1830_v41 = vadd.f32 %v961_v16, %v2585_v6 }
 0x232   : > { %v1485_v24 = vmul.f32 -1.442695, %v1821_v11 }
 0x233   : > { %v1486_v26 = vmul.f32 -1.442695, %v1822_v23  ;;  %v1487_v45 = vmul.f32 -1.442695, %v1830_v41 }
 0x234   : > { %1896 = vpow2.f32 %v1485_v24 }
 0x235   : > { %1898 = vpow2.f32 %v1486_v26 }
 0x236   : > { %1900 = vpow2.f32 %v1487_v45 }
 0x237   : > { %1902 = vtanh.f32 %v1829_v27 }
 0x23e   : > { %v1897_v34 = vpop.eup %1896 }
 0x23f   : > { %v1899_v35 = vpop.eup %1898  ;;  %v971_v36 = vadd.f32 1.0, %v1897_v34 }
 0x240   : > { %v977_v38 = vadd.f32 1.0, %v1899_v35  ;;  %v1901_v39 = vpop.eup %1900 }
 0x241   : > { %1904 = vrcp.f32 %v971_v36  ;;  %v1903_v40 = vpop.eup %1902  ;;  %v984_v56 = vadd.f32 1.0, %v1901_v39 }
 0x242   : > { %1906 = vrcp.f32 %v977_v38 }
 0x243   : > { %1908 = vrcp.f32 %v984_v56 }
 0x24b   : > { %v1905_v42 = vpop.eup %1904 }
 0x24c   : > { %v1907_v43 = vpop.eup %1906  ;;  %v988_v51 = vmul.f32 %v1905_v42, %v1903_v40 }
 0x24d   : > { %v987_v57 = vmul.f32 %v1907_v43, %v2591_v50  ;;  %v1909_v61 = vpop.eup %1908 }
 0x24f   : > { %v2637_v59 = vadd.f32 %v988_v51, %v987_v57 }
 0x251   : > { %1910 = vtanh.f32 %v2637_v59 }
 0x25b   : > { %v1911_v4 = vpop.eup %1910 }
 0x25c   : > { %v991_v5 = vmul.f32 %v1911_v4, %v1909_v61 }
 0x25e   : > { %v1000_v10 = vsel %vm999_vm4, %v991_v5, 0.0  ;;  %1073 = vmatmul.mubr.f32.vlgmr.msra.gmra.mrb[4].mxu0 %v991_v5  ;;  %1144 = vmatmul.mubr.f32.vlgmr.msra.gmra.mrb[4].mxu1 %v991_v5 }
 0x25f   : > { %1488 = vst [vmem:[%s2031_s30 + $0x8] sm:$0xff] %v1000_v10  ;;  %1758 = vmatpush1.bf16.msra.mxu0 %v2270_v52  ;;  %1790 = vmatpush1.bf16.msra.mxu1 %v2273_v53 }
 0x260   : > { %1760 = vmatprep.subr.bf16.mxu0 %v2275_v54  ;;  %1792 = vmatprep.subr.bf16.mxu1 %v2287_v58 }
 0x261   : > { %1258 = vmatprep.mubr.f32.mxu0 %v1969_v8  ;;  %1329 = vmatprep.mubr.f32.mxu1 %v1969_v8  ;;  %v1365_v8 = vstv %s1364_s18 }
 0x262   : > { %vm1366_vm5 = vcmp.gt.s32.totalorder %v2390_v31, %v1365_v8 }
 0x263   : > { %1762 = vmatpush1.bf16.msra.mxu0 %v2305_v0  ;;  %1794 = vmatpush1.bf16.msra.mxu1 %v2310_v2  ;;  %v1367_v52 = vsel %vm1366_vm5, 1, %v1970_v14 }
 0x264   : > { %1764 = vmatprep.subr.bf16.mxu0 %v2312_v3  ;;  %1796 = vmatprep.subr.bf16.mxu1 %v2324_v7 }
 0x265   : > { %1369 = vperm.xlu1 %1879, %v1367_v52  }
 0x267   : > { %1766 = vmatpush1.bf16.msra.mxu0 %v2344_v15  ;;  %1798 = vmatpush1.bf16.msra.mxu1 %v2349_v17 }
 0x268   : > { %1768 = vmatprep.subr.bf16.mxu0 %v2351_v18  ;;  %1800 = vmatprep.subr.bf16.mxu1 %v2363_v22 }
 0x26b   : > { %1770 = vmatpush1.bf16.msra.mxu0 %v2384_v29  ;;  %1802 = vmatpush1.bf16.msra.mxu1 %v2394_v32 }
 0x26c   : > { %1772 = vmatprep.subr.bf16.mxu0 %v2396_v33  ;;  %1804 = vmatprep.subr.bf16.mxu1 %v2409_v37 }
 0x26f   : > { %1774 = vmatpush1.bf16.msra.mxu0 %v2429_v44  ;;  %1806 = vmatpush1.bf16.msra.mxu1 %v2434_v47 }
 0x270   : > { %1776 = vmatprep.subr.bf16.mxu0 %v2436_v48  ;;  %1808 = vmatprep.subr.bf16.mxu1 %v2448_v55 }
 0x273   : > { %1778 = vmatpush1.bf16.msra.mxu0 %v2468_v62  ;;  %1810 = vmatpush1.bf16.msra.mxu1 %v2472_v63 }
 0x274   : > { %1780 = vmatprep.subr.bf16.mxu0 %v2474_v1  ;;  %1812 = vmatprep.subr.bf16.mxu1 %v2486_v9  ;;  %v1184_v1 = vpop.permute.xlu1 %1183 }
 0x275   : > { %vm1185_vm6 = vcmp.eq.s32.totalorder %v1184_v1, 1 }
 0x277   : > { %1782 = vmatpush1.bf16.msra.mxu0 %v2504_v19  ;;  %1814 = vmatpush1.bf16.msra.mxu1 %v2508_v20 }
 0x278   : > { %1784 = vmatprep.subr.bf16.mxu0 %v2510_v21  ;;  %1816 = vmatprep.subr.bf16.mxu1 %v2519_v25 }
 0x27b   : > { %1786 = vmatpush1.bf16.msra.mxu0 %v2528_v28  ;;  %1818 = vmatpush1.bf16.msra.mxu1 %v2532_v30 }
 0x2e4   : > { %v1370_v43 = vpop.permute.xlu1 %1369 }
 0x2e5   : > { %vm1371_vm7 = vcmp.eq.s32.totalorder %v1370_v43, 1 }
 0x331   : > { %v1074_v53 = vpop.f32.mrb[4].mxu0  ;;  %v1145_v54 = vpop.f32.mrb[4].mxu1 }
 0x332   : > { %v1823_v58 = vadd.f32 %v1074_v53, %v2579_v46  ;;  %v1076_v0 = vpop.f32.mrb[5].mxu0  ;;  %v1147_v2 = vpop.f32.mrb[5].mxu1  ;;  %v1831_v22 = vadd.f32 %v1145_v54, %v2588_v12 }
 0x333   : > { %v1824_v3 = vadd.f32 %v1076_v0, %v2581_v49  ;;  %v1832_v17 = vadd.f32 %v1147_v2, %v2585_v6 }
 0x334   : > { %v1489_v7 = vmul.f32 -1.442695, %v1823_v58 }
 0x335   : > { %v1490_v15 = vmul.f32 -1.442695, %v1824_v3  ;;  %v1491_v18 = vmul.f32 -1.442695, %v1832_v17 }
 0x336   : > { %1912 = vpow2.f32 %v1489_v7 }
 0x337   : > { %1914 = vpow2.f32 %v1490_v15 }
 0x338   : > { %1916 = vpow2.f32 %v1491_v18 }
 0x339   : > { %1918 = vtanh.f32 %v1831_v22 }
 0x340   : > { %v1913_v29 = vpop.eup %1912 }
 0x341   : > { %v1915_v14 = vpop.eup %1914  ;;  %v1157_v31 = vadd.f32 1.0, %v1913_v29 }
 0x342   : > { %v1163_v32 = vadd.f32 1.0, %v1915_v14  ;;  %v1917_v33 = vpop.eup %1916 }
 0x343   : > { %1920 = vrcp.f32 %v1157_v31  ;;  %v1919_v37 = vpop.eup %1918  ;;  %v1170_v55 = vadd.f32 1.0, %v1917_v33 }
 0x344   : > { %1922 = vrcp.f32 %v1163_v32 }
 0x345   : > { %1924 = vrcp.f32 %v1170_v55 }
 0x34d   : > { %v1921_v44 = vpop.eup %1920 }
 0x34e   : > { %v1923_v47 = vpop.eup %1922  ;;  %v1174_v48 = vmul.f32 %v1921_v44, %v1919_v37 }
 0x34f   : > { %v1173_v62 = vmul.f32 %v1923_v47, %v2637_v59  ;;  %v1925_v9 = vpop.eup %1924 }
 0x351   : > { %v1175_v63 = vadd.f32 %v1174_v48, %v1173_v62 }
 0x353   : > { %1926 = vtanh.f32 %v1175_v63 }
 0x35d   : > { %v1927_v19 = vpop.eup %1926 }
 0x35e   : > { %v1177_v20 = vmul.f32 %v1927_v19, %v1925_v9 }
 0x360   : > { %v1186_v21 = vsel %vm1185_vm6, %v1177_v20, 0.0  ;;  %1259 = vmatmul.mubr.f32.vlgmr.msra.gmra.mrb[6].mxu0 %v1177_v20  ;;  %1330 = vmatmul.mubr.f32.vlgmr.msra.gmra.mrb[6].mxu1 %v1177_v20 }
 0x361   : > { %1492 = vst [vmem:[%s2031_s30 + $0x10] sm:$0xff] %v1186_v21 }
 0x433   : > { %v1260_v25 = vpop.f32.mrb[6].mxu0  ;;  %v1331_v28 = vpop.f32.mrb[6].mxu1 }
 0x434   : > { %v1825_v30 = vadd.f32 %v1260_v25, %v2579_v46  ;;  %v1262_v50 = vpop.f32.mrb[7].mxu0  ;;  %v1333_v11 = vpop.f32.mrb[7].mxu1  ;;  %v1833_v41 = vadd.f32 %v1331_v28, %v2588_v12 }
 0x435   : > { %v1826_v13 = vadd.f32 %v1262_v50, %v2581_v49  ;;  %v1834_v24 = vadd.f32 %v1333_v11, %v2585_v6 }
 0x436   : > { %v1493_v16 = vmul.f32 -1.442695, %v1825_v30 }
 0x437   : > { %v1494_v23 = vmul.f32 -1.442695, %v1826_v13  ;;  %v1495_v26 = vmul.f32 -1.442695, %v1834_v24 }
 0x438   : > { %1928 = vpow2.f32 %v1493_v16 }
 0x439   : > { %1930 = vpow2.f32 %v1494_v23 }
 0x43a   : > { %1932 = vpow2.f32 %v1495_v26 }
 0x43b   : > { %1934 = vtanh.f32 %v1833_v41 }
 0x442   : > { %v1929_v45 = vpop.eup %1928 }
 0x443   : > { %v1931_v27 = vpop.eup %1930  ;;  %v1343_v34 = vadd.f32 1.0, %v1929_v45 }
 0x444   : > { %v1349_v35 = vadd.f32 1.0, %v1931_v27  ;;  %v1933_v46 = vpop.eup %1932 }
 0x445   : > { %1936 = vrcp.f32 %v1343_v34  ;;  %v1935_v36 = vpop.eup %1934  ;;  %v1356_v40 = vadd.f32 1.0, %v1933_v46 }
 0x446   : > { %1938 = vrcp.f32 %v1349_v35 }
 0x447   : > { %1940 = vrcp.f32 %v1356_v40 }
 0x44f   : > { %v1937_v49 = vpop.eup %1936 }
 0x450   : > { %v1939_v38 = vpop.eup %1938  ;;  %v1360_v39 = vmul.f32 %v1937_v49, %v1935_v36 }
 0x451   : > { %v1359_v42 = vmul.f32 %v1939_v38, %v1175_v63  ;;  %v1941_v12 = vpop.eup %1940 }
 0x453   : > { %v1361_v6 = vadd.f32 %v1360_v39, %v1359_v42 }
 0x455   : > { %1942 = vtanh.f32 %v1361_v6  ;;  %1376 = vst [vmem:[#allocation4] sm:$0xff] %v1361_v6 }
 0x45f   : > { %v1943_v51 = vpop.eup %1942 }
 0x460   : > { %v1363_v56 = vmul.f32 %v1943_v51, %v1941_v12 }
 0x462   : > { %v1372_v57 = vsel %vm1371_vm7, %v1363_v56, 0.0  ;;  %1375 = vst [vmem:[#allocation3] sm:$0xff] %v1363_v56 }
 0x463   : > { %1496 = vst [vmem:[%s2031_s30 + $0x18] sm:$0xff] %v1372_v57 }
 0x464 PF: > { %s15_s20 = sadd.s32 1, %s1966_s20   ;;  %s2702_s18 = smov %s1962_s19 }
 0x465   : > { %p12_p6 = scmp.ge.s32.totalorder %s15_s20, 4   ;;  %s2703_s19 = smov %s2705_s21 }
 0x467   :  { %14 = sbr.rel (!%p12_p6) target bundleno = 2 (0x2), region = 83 }

</bundles_post_ra>
